<compile_context>
chip_gen: v7x
topology: tpu7x:2x2x1
jax: 0.10.0
libtpu: 0.0.40
codegen_flags: <defaults>
</compile_context>

<pallas_src>
import functools

import jax
import jax.numpy as jnp
from jax import lax
from jax.experimental import pallas as pl
from jax.experimental.pallas import tpu as pltpu


def attention_prop_kernel(x1_ref, x2_ref,
                          wq_ref, bq_ref, wkv_ref, bkv_ref,
                          wmh_ref, bmh_ref,
                          wc1a_ref, wc1b_ref, bc1_ref,
                          wc2_ref, bc2_ref,
                          out_ref,
                          kv_scratch,
                          *, head, head_dim):
    f32 = jnp.float32
    bf16 = jnp.bfloat16
    C = head * head_dim

    x1 = x1_ref[...]                      # (C, TN) f32 (kept f32 for the residual)
    x1b = x1.astype(bf16)                 # bf16 copy for the MXU matmuls

    # Fused K/V projection: computed once per batch (n-tile index 0), cached in VMEM
    # scratch and reused for every N tile of this batch.
    @pl.when(pl.program_id(1) == 0)
    def _():
        kv_scratch[...] = (jnp.dot(wkv_ref[...], x2_ref[...],
                                   preferred_element_type=f32)
                           + bkv_ref[...])                          # (2C, M)

    # Query projection (1/sqrt(head_dim) already folded into wq/bq on the host).
    q = jnp.dot(wq_ref[...], x1b, preferred_element_type=f32) + bq_ref[...]   # (C, TN)

    kv = kv_scratch[...]
    k = kv[:C, :]                         # (C, M)   sublane slice at multiple-of-8
    v = kv[C:, :]                         # (C, M)

    tn = q.shape[-1]
    m = k.shape[-1]
    # (C, X) -> (head, head_dim, X): pure sublane regroup (head_dim == 8 == f32 tile).
    q_h = q.reshape(head, head_dim, tn)
    k_h = k.reshape(head, head_dim, m)
    v_h = v.reshape(head, head_dim, m)

    # Batched over heads, contract head_dim; no transposes.
    s = lax.dot_general(q_h, k_h, (((1,), (1,)), ((0,), (0,))),
                        preferred_element_type=f32)                 # (head, TN, M)
    s = s - jnp.max(s, axis=-1, keepdims=True)
    e = jnp.exp(s)
    denom = jnp.sum(e, axis=-1, keepdims=True)                      # (head, TN, 1)
    inv = pl.reciprocal(denom, approx=True)                         # EUP slot
    inv = inv * (2.0 - denom * inv)                                 # Newton -> ~f32 exact
    p = e * inv                                                     # softmax over M

    # Batched over heads, contract M; output (head, head_dim, TN) -> (C, TN).
    o_h = lax.dot_general(v_h, p, (((2,), (2,)), ((0,), (0,))),
                          preferred_element_type=f32)
    add_value = o_h.reshape(C, tn)

    # mh_filter (bf16 operands, f32 accumulation).
    mh = (jnp.dot(wmh_ref[...], add_value.astype(bf16),
                  preferred_element_type=f32) + bmh_ref[...])

    # cat_filter: concat removed (wc1 split by column blocks), eval-mode BatchNorm
    # folded into wc1a / wc1b / bc1 on the host.
    h1 = (jnp.dot(wc1a_ref[...], x1b, preferred_element_type=f32)
          + jnp.dot(wc1b_ref[...], mh.astype(bf16), preferred_element_type=f32)
          + bc1_ref[...])
    r = jnp.maximum(h1, 0.0)                                        # f32 epilogue
    h2 = (jnp.dot(wc2_ref[...], r.astype(bf16), preferred_element_type=f32)
          + bc2_ref[...])

    out_ref[...] = x1 + h2                                          # residual in f32


def attention_propagation(x1, x2, params, head):
    B, C, N = x1.shape
    M = x2.shape[-1]
    head_dim = C // head
    assert C % head == 0
    assert C % 8 == 0, "channels must be sublane-aligned"
    assert head_dim % 8 == 0, "per-head reshape assumes f32 sublane alignment"

    f32 = jnp.float32
    bf16 = jnp.bfloat16

    # ---- host-side (one-time) parameter folding ----
    scale = 1.0 / (head_dim ** 0.5)
    wq = (params["wq"] * scale).astype(bf16)       # fold 1/sqrt(d) into the query proj
    bq = (params["bq"] * scale).astype(f32)
    wkv = jnp.concatenate([params["wk"], params["wv"]], axis=0).astype(bf16)   # (2C, C)
    bkv = jnp.concatenate([params["bk"], params["bv"]], axis=0).astype(f32)    # (2C, 1)
    bn_scale = params["gamma"] * lax.rsqrt(params["var"] + 1e-5)               # (2C, 1)
    wc1f = params["wc1"] * bn_scale                                            # row scale
    bc1f = (bn_scale * (params["bc1"] - params["mean"]) + params["beta"]).astype(f32)
    wc1a = wc1f[:, :C].astype(bf16)                # multiplies x1
    wc1b = wc1f[:, C:].astype(bf16)                # multiplies mh
    wmh = params["wmh"].astype(bf16)
    bmh = params["bmh"].astype(f32)
    wc2 = params["wc2"].astype(bf16)
    bc2 = params["bc2"].astype(f32)

    # ---- pad N to a multiple of 128 so output stores are lane-dense ----
    LANE = 128
    N_pad = ((N + LANE - 1) // LANE) * LANE
    x1p = x1 if N_pad == N else jnp.pad(x1, ((0, 0), (0, 0), (0, N_pad - N)))
    for cand in (512, 256, 128):                   # largest lane-dense tile dividing N_pad
        if N_pad % cand == 0:
            TN = cand
            break
    NT = N_pad // TN

    x2b = x2.astype(bf16)                          # only feeds the k/v matmul

    weights = [wq, bq, wkv, bkv, wmh, bmh, wc1a, wc1b, bc1f, wc2, bc2]

    def wspec(a):
        nd = a.ndim
        return pl.BlockSpec(a.shape, lambda b, n: (0,) * nd)   # resident across grid

    kernel = functools.partial(attention_prop_kernel, head=head, head_dim=head_dim)

    out = pl.pallas_call(
        kernel,
        out_shape=jax.ShapeDtypeStruct((B, C, N_pad), f32),
        grid_spec=pltpu.PrefetchScalarGridSpec(
            num_scalar_prefetch=0,
            grid=(B, NT),
            in_specs=[
                # DMA does the batch select; kernel sees (C, TN) / (C, M).
                pl.BlockSpec((pl.Squeezed(), C, TN), lambda b, n: (b, 0, n)),
                pl.BlockSpec((pl.Squeezed(), C, M), lambda b, n: (b, 0, 0)),
            ] + [wspec(w) for w in weights],
            out_specs=pl.BlockSpec((pl.Squeezed(), C, TN), lambda b, n: (b, 0, n)),
            scratch_shapes=[pltpu.VMEM((2 * C, M), f32)],       # cached k/v per batch
        ),
        compiler_params=pltpu.CompilerParams(
            dimension_semantics=("parallel", "arbitrary"),      # megacore over batch
            vmem_limit_bytes=32 * 1024 * 1024),
    )(x1p, x2b, *weights)

    return out[:, :, :N]


def reference_forward(x1, x2, params, head):
    """Pure-JAX f32 reference replicating the PyTorch forward (mode='full')."""
    B, C, N = x1.shape
    head_dim = C // head

    def conv1x1(x, w, b):
        return jnp.einsum('oc,bcn->bon', w, x) + b[None, :, :]

    q = conv1x1(x1, params["wq"], params["bq"]).reshape(B, head, head_dim, N)
    k = conv1x1(x2, params["wk"], params["bk"]).reshape(B, head, head_dim, -1)
    v = conv1x1(x2, params["wv"], params["bv"]).reshape(B, head, head_dim, -1)
    qk = jnp.einsum('bhdn,bhdm->bhnm', q, k) / (head_dim ** 0.5)
    score = jax.nn.softmax(qk, axis=-1)
    add_value = jnp.einsum('bhnm,bhdm->bhdn', score, v).reshape(B, C, N)
    add_value = conv1x1(add_value, params["wmh"], params["bmh"])
    cat = jnp.concatenate([x1, add_value], axis=1)
    h1 = conv1x1(cat, params["wc1"], params["bc1"])
    bn = ((h1 - params["mean"][None]) * lax.rsqrt(params["var"][None] + 1e-5)
          * params["gamma"][None] + params["beta"][None])
    r = jnp.maximum(bn, 0.0)
    h2 = conv1x1(r, params["wc2"], params["bc2"])
    return x1 + h2


if __name__ == "__main__":
    B, C, N, M = 2, 32, 16, 16
    head = 4

    key = jax.random.PRNGKey(0)
    ks = jax.random.split(key, 16)

    def w(k, shape, scale=0.1):
        return (scale * jax.random.normal(k, shape)).astype(jnp.float32)

    # Deterministic synthetic parameters (Conv1d weights squeezed to (out, in)).
    # Biases / BN params stored as column vectors so they broadcast over positions.
    params = {
        "wq": w(ks[0], (C, C)), "bq": w(ks[1], (C, 1)),
        "wk": w(ks[2], (C, C)), "bk": w(ks[3], (C, 1)),
        "wv": w(ks[4], (C, C)), "bv": w(ks[5], (C, 1)),
        "wmh": w(ks[6], (C, C)), "bmh": w(ks[7], (C, 1)),
        "wc1": w(ks[8], (2 * C, 2 * C)), "bc1": w(ks[9], (2 * C, 1)),
        "gamma": jnp.ones((2 * C, 1), jnp.float32),
        "beta": jnp.zeros((2 * C, 1), jnp.float32),
        "mean": jnp.zeros((2 * C, 1), jnp.float32),
        "var": jnp.ones((2 * C, 1), jnp.float32),
        "wc2": w(ks[10], (C, 2 * C)), "bc2": w(ks[11], (C, 1)),
    }

    x1 = jax.random.normal(ks[12], (B, C, N), jnp.float32)
    x2 = jax.random.normal(ks[13], (B, C, M), jnp.float32)

    out = attention_propagation(x1, x2, params, head)
    out = jax.block_until_ready(out)

    ref = reference_forward(x1, x2, params, head)
    assert out.shape == (B, C, N)
    # Tolerance reflects bf16 MXU operands (f32 accumulation) vs the pure-f32 reference;
    # softmax statistics, ReLU epilogue and the residual add are computed in f32.
    assert jnp.allclose(out, ref, atol=3e-2, rtol=3e-2), "mismatch vs JAX reference"

    print("KERNEL_OK")
</pallas_src>

<mosaic_0001>
module attributes {stable_mosaic.version = 11 : i64} {
  func.func @attention_prop_kernel(%arg0: i32, %arg1: i32, %arg2: memref<1x32x128xf32, #tpu.memory_space<vmem>>, %arg3: memref<1x32x16xbf16, #tpu.memory_space<vmem>>, %arg4: memref<32x32xbf16, #tpu.memory_space<vmem>>, %arg5: memref<32x1xf32, #tpu.memory_space<vmem>>, %arg6: memref<64x32xbf16, #tpu.memory_space<vmem>>, %arg7: memref<64x1xf32, #tpu.memory_space<vmem>>, %arg8: memref<32x32xbf16, #tpu.memory_space<vmem>>, %arg9: memref<32x1xf32, #tpu.memory_space<vmem>>, %arg10: memref<64x32xbf16, #tpu.memory_space<vmem>>, %arg11: memref<64x32xbf16, #tpu.memory_space<vmem>>, %arg12: memref<64x1xf32, #tpu.memory_space<vmem>>, %arg13: memref<32x64xbf16, #tpu.memory_space<vmem>>, %arg14: memref<32x1xf32, #tpu.memory_space<vmem>>, %arg15: memref<1x32x128xf32, #tpu.memory_space<vmem>>, %arg16: memref<64x16xf32, #tpu.memory_space<vmem>>) attributes {dimension_semantics = [#tpu.dimension_semantics<parallel>, #tpu.dimension_semantics<arbitrary>], iteration_bounds = array<i64: 2, 1>, scalar_prefetch = 0 : i64, scratch_operands = 1 : i64, tpu.core_type = #tpu.core_type<tc>, window_params = [{transform_indices = @transform_0, window_bounds = array<i64: 1, 32, 128>}, {transform_indices = @transform_1, window_bounds = array<i64: 1, 32, 16>}, {pipeline_mode = #tpu.pipeline_mode<synchronous>, transform_indices = @transform_2, window_bounds = array<i64: 32, 32>}, {pipeline_mode = #tpu.pipeline_mode<synchronous>, transform_indices = @transform_3, window_bounds = array<i64: 32, 1>}, {pipeline_mode = #tpu.pipeline_mode<synchronous>, transform_indices = @transform_4, window_bounds = array<i64: 64, 32>}, {pipeline_mode = #tpu.pipeline_mode<synchronous>, transform_indices = @transform_5, window_bounds = array<i64: 64, 1>}, {pipeline_mode = #tpu.pipeline_mode<synchronous>, transform_indices = @transform_6, window_bounds = array<i64: 32, 32>}, {pipeline_mode = #tpu.pipeline_mode<synchronous>, transform_indices = @transform_7, window_bounds = array<i64: 32, 1>}, {pipeline_mode = #tpu.pipeline_mode<synchronous>, transform_indices = @transform_8, window_bounds = array<i64: 64, 32>}, {pipeline_mode = #tpu.pipeline_mode<synchronous>, transform_indices = @transform_9, window_bounds = array<i64: 64, 32>}, {pipeline_mode = #tpu.pipeline_mode<synchronous>, transform_indices = @transform_10, window_bounds = array<i64: 64, 1>}, {pipeline_mode = #tpu.pipeline_mode<synchronous>, transform_indices = @transform_11, window_bounds = array<i64: 32, 64>}, {pipeline_mode = #tpu.pipeline_mode<synchronous>, transform_indices = @transform_12, window_bounds = array<i64: 32, 1>}, {transform_indices = @transform_13, window_bounds = array<i64: 1, 32, 128>}]} {
    %c0 = arith.constant 0 : index
    %c0_0 = arith.constant 0 : index
    %c0_1 = arith.constant 0 : index
    %0 = vector.load %arg2[%c0, %c0_0, %c0_1] : memref<1x32x128xf32, #tpu.memory_space<vmem>>, vector<1x32x128xf32>
    %1 = vector.shape_cast %0 : vector<1x32x128xf32> to vector<32x128xf32>
    %2 = arith.truncf %1 : vector<32x128xf32> to vector<32x128xbf16>
    %c0_i32 = arith.constant 0 : i32
    %3 = arith.cmpi eq, %arg1, %c0_i32 : i32
    %4 = arith.extui %3 : i1 to i32
    %c0_i32_2 = arith.constant 0 : i32
    %5 = arith.cmpi ne, %4, %c0_i32_2 : i32
    scf.if %5 {
      %c0_36 = arith.constant 0 : index
      %c0_37 = arith.constant 0 : index
      %61 = vector.load %arg6[%c0_36, %c0_37] : memref<64x32xbf16, #tpu.memory_space<vmem>>, vector<64x32xbf16>
      %c0_38 = arith.constant 0 : index
      %c0_39 = arith.constant 0 : index
      %c0_40 = arith.constant 0 : index
      %62 = vector.load %arg3[%c0_38, %c0_39, %c0_40] : memref<1x32x16xbf16, #tpu.memory_space<vmem>>, vector<1x32x16xbf16>
      %63 = vector.shape_cast %62 : vector<1x32x16xbf16> to vector<32x16xbf16>
      %cst_41 = arith.constant dense<0.000000e+00> : vector<64x16xf32>
      %64 = tpu.matmul %61, %63, %cst_41 {dimension_numbers = #tpu.dot_dimension_numbers<[1], [0], [0], [1], [0, 0, 1, 1], [], []>} : vector<64x32xbf16>, vector<32x16xbf16>, vector<64x16xf32> -> vector<64x16xf32>
      %c0_42 = arith.constant 0 : index
      %c0_43 = arith.constant 0 : index
      %65 = vector.load %arg7[%c0_42, %c0_43] : memref<64x1xf32, #tpu.memory_space<vmem>>, vector<64x1xf32>
      %66 = vector.broadcast %65 : vector<64x1xf32> to vector<64x16xf32>
      %67 = arith.addf %64, %66 : vector<64x16xf32>
      %c0_44 = arith.constant 0 : index
      %c0_45 = arith.constant 0 : index
      %68 = vector.load %arg16[%c0_44, %c0_45] : memref<64x16xf32, #tpu.memory_space<vmem>>, vector<64x16xf32>
      tpu.vector_store %arg16[%c0_44, %c0_45], %67 {strides = array<i32>} : memref<64x16xf32, #tpu.memory_space<vmem>>, vector<64x16xf32>,
    } else {
    }
    %c0_3 = arith.constant 0 : index
    %c0_4 = arith.constant 0 : index
    %6 = vector.load %arg4[%c0_3, %c0_4] : memref<32x32xbf16, #tpu.memory_space<vmem>>, vector<32x32xbf16>
    %cst = arith.constant dense<0.000000e+00> : vector<32x128xf32>
    %7 = tpu.matmul %6, %2, %cst {dimension_numbers = #tpu.dot_dimension_numbers<[1], [0], [0], [1], [0, 0, 1, 1], [], []>} : vector<32x32xbf16>, vector<32x128xbf16>, vector<32x128xf32> -> vector<32x128xf32>
    %c0_5 = arith.constant 0 : index
    %c0_6 = arith.constant 0 : index
    %8 = vector.load %arg5[%c0_5, %c0_6] : memref<32x1xf32, #tpu.memory_space<vmem>>, vector<32x1xf32>
    %9 = vector.broadcast %8 : vector<32x1xf32> to vector<32x128xf32>
    %10 = arith.addf %7, %9 : vector<32x128xf32>
    %c0_7 = arith.constant 0 : index
    %c0_8 = arith.constant 0 : index
    %11 = vector.load %arg16[%c0_7, %c0_8] : memref<64x16xf32, #tpu.memory_space<vmem>>, vector<64x16xf32>
    %12 = vector.extract_strided_slice %11 {offsets = [0, 0], sizes = [32, 16], strides = [1, 1]} : vector<64x16xf32> to vector<32x16xf32>
    %13 = vector.extract_strided_slice %11 {offsets = [32, 0], sizes = [32, 16], strides = [1, 1]} : vector<64x16xf32> to vector<32x16xf32>
    %14 = vector.shape_cast %10 : vector<32x128xf32> to vector<4x8x128xf32>
    %15 = vector.shape_cast %12 : vector<32x16xf32> to vector<4x8x16xf32>
    %16 = vector.shape_cast %13 : vector<32x16xf32> to vector<4x8x16xf32>
    %cst_9 = arith.constant dense<0.000000e+00> : vector<4x128x16xf32>
    %17 = tpu.matmul %14, %15, %cst_9 {dimension_numbers = #tpu.dot_dimension_numbers<[1], [1], [2], [2], [0, 0, 0, 2, 1, 2], [0], [0]>} : vector<4x8x128xf32>, vector<4x8x16xf32>, vector<4x128x16xf32> -> vector<4x128x16xf32>
    %cst_10 = arith.constant dense<0xFF800000> : vector<4x128xf32>
    %18 = vector.multi_reduction <maximumf>, %17, %cst_10 [2] : vector<4x128x16xf32> to vector<4x128xf32>
    %19 = vector.shape_cast %18 : vector<4x128xf32> to vector<4x128x1xf32>
    %20 = vector.broadcast %19 : vector<4x128x1xf32> to vector<4x128x16xf32>
    %21 = arith.subf %17, %20 : vector<4x128x16xf32>
    %22 = math.exp %21 : vector<4x128x16xf32>
    %cst_11 = arith.constant dense<0.000000e+00> : vector<4x128xf32>
    %23 = vector.multi_reduction <add>, %22, %cst_11 [2] : vector<4x128x16xf32> to vector<4x128xf32>
    %24 = vector.shape_cast %23 : vector<4x128xf32> to vector<4x128x1xf32>
    %25 = tpu.reciprocal %24 {approx = true} : vector<4x128x1xf32> -> vector<4x128x1xf32>
    %26 = arith.mulf %24, %25 : vector<4x128x1xf32>
    %cst_12 = arith.constant 2.000000e+00 : f32
    %27 = vector.broadcast %cst_12 : f32 to vector<4x128x1xf32>
    %28 = arith.subf %27, %26 : vector<4x128x1xf32>
    %29 = arith.mulf %25, %28 : vector<4x128x1xf32>
    %30 = vector.broadcast %29 : vector<4x128x1xf32> to vector<4x128x16xf32>
    %31 = arith.mulf %22, %30 : vector<4x128x16xf32>
    %cst_13 = arith.constant dense<0.000000e+00> : vector<4x8x128xf32>
    %32 = tpu.matmul %16, %31, %cst_13 {dimension_numbers = #tpu.dot_dimension_numbers<[2], [2], [1], [1], [0, 0, 0, 1, 1, 1], [0], [0]>} : vector<4x8x16xf32>, vector<4x128x16xf32>, vector<4x8x128xf32> -> vector<4x8x128xf32>
    %33 = vector.shape_cast %32 : vector<4x8x128xf32> to vector<32x128xf32>
    %c0_14 = arith.constant 0 : index
    %c0_15 = arith.constant 0 : index
    %34 = vector.load %arg8[%c0_14, %c0_15] : memref<32x32xbf16, #tpu.memory_space<vmem>>, vector<32x32xbf16>
    %35 = arith.truncf %33 : vector<32x128xf32> to vector<32x128xbf16>
    %cst_16 = arith.constant dense<0.000000e+00> : vector<32x128xf32>
    %36 = tpu.matmul %34, %35, %cst_16 {dimension_numbers = #tpu.dot_dimension_numbers<[1], [0], [0], [1], [0, 0, 1, 1], [], []>} : vector<32x32xbf16>, vector<32x128xbf16>, vector<32x128xf32> -> vector<32x128xf32>
    %c0_17 = arith.constant 0 : index
    %c0_18 = arith.constant 0 : index
    %37 = vector.load %arg9[%c0_17, %c0_18] : memref<32x1xf32, #tpu.memory_space<vmem>>, vector<32x1xf32>
    %38 = vector.broadcast %37 : vector<32x1xf32> to vector<32x128xf32>
    %39 = arith.addf %36, %38 : vector<32x128xf32>
    %c0_19 = arith.constant 0 : index
    %c0_20 = arith.constant 0 : index
    %40 = vector.load %arg10[%c0_19, %c0_20] : memref<64x32xbf16, #tpu.memory_space<vmem>>, vector<64x32xbf16>
    %cst_21 = arith.constant dense<0.000000e+00> : vector<64x128xf32>
    %41 = tpu.matmul %40, %2, %cst_21 {dimension_numbers = #tpu.dot_dimension_numbers<[1], [0], [0], [1], [0, 0, 1, 1], [], []>} : vector<64x32xbf16>, vector<32x128xbf16>, vector<64x128xf32> -> vector<64x128xf32>
    %c0_22 = arith.constant 0 : index
    %c0_23 = arith.constant 0 : index
    %42 = vector.load %arg11[%c0_22, %c0_23] : memref<64x32xbf16, #tpu.memory_space<vmem>>, vector<64x32xbf16>
    %43 = arith.truncf %39 : vector<32x128xf32> to vector<32x128xbf16>
    %cst_24 = arith.constant dense<0.000000e+00> : vector<64x128xf32>
    %44 = tpu.matmul %42, %43, %cst_24 {dimension_numbers = #tpu.dot_dimension_numbers<[1], [0], [0], [1], [0, 0, 1, 1], [], []>} : vector<64x32xbf16>, vector<32x128xbf16>, vector<64x128xf32> -> vector<64x128xf32>
    %45 = arith.addf %41, %44 : vector<64x128xf32>
    %c0_25 = arith.constant 0 : index
    %c0_26 = arith.constant 0 : index
    %46 = vector.load %arg12[%c0_25, %c0_26] : memref<64x1xf32, #tpu.memory_space<vmem>>, vector<64x1xf32>
    %47 = vector.broadcast %46 : vector<64x1xf32> to vector<64x128xf32>
    %48 = arith.addf %45, %47 : vector<64x128xf32>
    %cst_27 = arith.constant 0.000000e+00 : f32
    %49 = vector.broadcast %cst_27 : f32 to vector<64x128xf32>
    %50 = arith.maximumf %48, %49 : vector<64x128xf32>
    %c0_28 = arith.constant 0 : index
    %c0_29 = arith.constant 0 : index
    %51 = vector.load %arg13[%c0_28, %c0_29] : memref<32x64xbf16, #tpu.memory_space<vmem>>, vector<32x64xbf16>
    %52 = arith.truncf %50 : vector<64x128xf32> to vector<64x128xbf16>
    %cst_30 = arith.constant dense<0.000000e+00> : vector<32x128xf32>
    %53 = tpu.matmul %51, %52, %cst_30 {dimension_numbers = #tpu.dot_dimension_numbers<[1], [0], [0], [1], [0, 0, 1, 1], [], []>} : vector<32x64xbf16>, vector<64x128xbf16>, vector<32x128xf32> -> vector<32x128xf32>
    %c0_31 = arith.constant 0 : index
    %c0_32 = arith.constant 0 : index
    %54 = vector.load %arg14[%c0_31, %c0_32] : memref<32x1xf32, #tpu.memory_space<vmem>>, vector<32x1xf32>
    %55 = vector.broadcast %54 : vector<32x1xf32> to vector<32x128xf32>
    %56 = arith.addf %53, %55 : vector<32x128xf32>
    %57 = arith.addf %1, %56 : vector<32x128xf32>
    %c0_33 = arith.constant 0 : index
    %c0_34 = arith.constant 0 : index
    %c0_35 = arith.constant 0 : index
    %58 = vector.load %arg15[%c0_33, %c0_34, %c0_35] : memref<1x32x128xf32, #tpu.memory_space<vmem>>, vector<1x32x128xf32>
    %59 = vector.shape_cast %58 : vector<1x32x128xf32> to vector<32x128xf32>
    %60 = vector.shape_cast %57 : vector<32x128xf32> to vector<1x32x128xf32>
    tpu.vector_store %arg15[%c0_33, %c0_34, %c0_35], %60 {strides = array<i32>} : memref<1x32x128xf32, #tpu.memory_space<vmem>>, vector<1x32x128xf32>,
    return
  }
  func.func @transform_0(%arg0: i32, %arg1: i32) -> (i32, i32, i32) {
    %c0_i32 = arith.constant 0 : i32
    %c0_i32_0 = arith.constant 0 : i32
    return %arg0, %c0_i32, %arg1 : i32, i32, i32
  }
  func.func @transform_1(%arg0: i32, %arg1: i32) -> (i32, i32, i32) {
    %c0_i32 = arith.constant 0 : i32
    %c0_i32_0 = arith.constant 0 : i32
    %c0_i32_1 = arith.constant 0 : i32
    return %arg0, %c0_i32, %c0_i32_0 : i32, i32, i32
  }
  func.func @transform_2(%arg0: i32, %arg1: i32) -> (i32, i32) {
    %c0_i32 = arith.constant 0 : i32
    %c0_i32_0 = arith.constant 0 : i32
    %c0_i32_1 = arith.constant 0 : i32
    return %c0_i32, %c0_i32_0 : i32, i32
  }
  func.func @transform_3(%arg0: i32, %arg1: i32) -> (i32, i32) {
    %c0_i32 = arith.constant 0 : i32
    %c0_i32_0 = arith.constant 0 : i32
    %c0_i32_1 = arith.constant 0 : i32
    return %c0_i32, %c0_i32_0 : i32, i32
  }
  func.func @transform_4(%arg0: i32, %arg1: i32) -> (i32, i32) {
    %c0_i32 = arith.constant 0 : i32
    %c0_i32_0 = arith.constant 0 : i32
    %c0_i32_1 = arith.constant 0 : i32
    return %c0_i32, %c0_i32_0 : i32, i32
  }
  func.func @transform_5(%arg0: i32, %arg1: i32) -> (i32, i32) {
    %c0_i32 = arith.constant 0 : i32
    %c0_i32_0 = arith.constant 0 : i32
    %c0_i32_1 = arith.constant 0 : i32
    return %c0_i32, %c0_i32_0 : i32, i32
  }
  func.func @transform_6(%arg0: i32, %arg1: i32) -> (i32, i32) {
    %c0_i32 = arith.constant 0 : i32
    %c0_i32_0 = arith.constant 0 : i32
    %c0_i32_1 = arith.constant 0 : i32
    return %c0_i32, %c0_i32_0 : i32, i32
  }
  func.func @transform_7(%arg0: i32, %arg1: i32) -> (i32, i32) {
    %c0_i32 = arith.constant 0 : i32
    %c0_i32_0 = arith.constant 0 : i32
    %c0_i32_1 = arith.constant 0 : i32
    return %c0_i32, %c0_i32_0 : i32, i32
  }
  func.func @transform_8(%arg0: i32, %arg1: i32) -> (i32, i32) {
    %c0_i32 = arith.constant 0 : i32
    %c0_i32_0 = arith.constant 0 : i32
    %c0_i32_1 = arith.constant 0 : i32
    return %c0_i32, %c0_i32_0 : i32, i32
  }
  func.func @transform_9(%arg0: i32, %arg1: i32) -> (i32, i32) {
    %c0_i32 = arith.constant 0 : i32
    %c0_i32_0 = arith.constant 0 : i32
    %c0_i32_1 = arith.constant 0 : i32
    return %c0_i32, %c0_i32_0 : i32, i32
  }
  func.func @transform_10(%arg0: i32, %arg1: i32) -> (i32, i32) {
    %c0_i32 = arith.constant 0 : i32
    %c0_i32_0 = arith.constant 0 : i32
    %c0_i32_1 = arith.constant 0 : i32
    return %c0_i32, %c0_i32_0 : i32, i32
  }
  func.func @transform_11(%arg0: i32, %arg1: i32) -> (i32, i32) {
    %c0_i32 = arith.constant 0 : i32
    %c0_i32_0 = arith.constant 0 : i32
    %c0_i32_1 = arith.constant 0 : i32
    return %c0_i32, %c0_i32_0 : i32, i32
  }
  func.func @transform_12(%arg0: i32, %arg1: i32) -> (i32, i32) {
    %c0_i32 = arith.constant 0 : i32
    %c0_i32_0 = arith.constant 0 : i32
    %c0_i32_1 = arith.constant 0 : i32
    return %c0_i32, %c0_i32_0 : i32, i32
  }
  func.func @transform_13(%arg0: i32, %arg1: i32) -> (i32, i32, i32) {
    %c0_i32 = arith.constant 0 : i32
    %c0_i32_0 = arith.constant 0 : i32
    return %arg0, %c0_i32, %arg1 : i32, i32, i32
  }
}

</mosaic_0001>

<bundles_post_ra>
// kernel: tpu_custom_call.1
= control target key start
LH: loop header
LB: loop body
LE: loop exit
PB: predicated region body
PF: predicated region fallthrough
CT: control target
= control target key end

     0   :  { %18 = vsyncpa [#allocation4], 0  ;;  %s6142_s0 = inlined_call_operand.vmem [shape: f32[2,32,128], index: 0, kind: input, shape index: {}]   ;;  %s6143_s1 = inlined_call_operand.vmem [shape: bf16[2,32,16], index: 1, kind: input, shape index: {}]   ;;  %s6144_s2 = inlined_call_operand.vmem [shape: bf16[32,32], index: 2, kind: input, shape index: {}]   ;;  %s6145_s3 = inlined_call_operand.vmem [shape: f32[32,1], index: 3, kind: input, shape index: {}]   ;;  %s6146_s4 = inlined_call_operand.vmem [shape: bf16[64,32], index: 4, kind: input, shape index: {}]   ;;  %s6147_s5 = inlined_call_operand.vmem [shape: f32[64,1], index: 5, kind: input, shape index: {}]   ;;  %s6148_s6 = inlined_call_operand.vmem [shape: bf16[32,32], index: 6, kind: input, shape index: {}]   ;;  %s6149_s7 = inlined_call_operand.vmem [shape: f32[32,1], index: 7, kind: input, shape index: {}]   ;;  %s6150_s8 = inlined_call_operand.vmem [shape: bf16[64,32], index: 8, kind: input, shape index: {}]   ;;  %s6151_s9 = inlined_call_operand.vmem [shape: bf16[64,32], index: 9, kind: input, shape index: {}]   ;;  %s6152_s10 = inlined_call_operand.vmem [shape: f32[64,1], index: 10, kind: input, shape index: {}]   ;;  %s6153_s11 = inlined_call_operand.vmem [shape: bf16[32,64], index: 11, kind: input, shape index: {}]   ;;  %s6154_s12 = inlined_call_operand.vmem [shape: f32[32,1], index: 12, kind: input, shape index: {}]   ;;  %s6155_s13 = inlined_call_operand.hbm [shape: f32[2,32,128], index: 13, kind: output, shape index: {}]  }
   0x1   :  { %20 = vsyncpa [#allocation4 + $0x1], 0  ;;  %s4944_s25 = smov 0   ;;  %s4946_s26 = smov 0  }
   0x2   :  { %s4948_s27 = smov 0   ;;  %s4950_s28 = smov 0  }
   0x3   :  { %s4952_s29 = smov 0   ;;  %s4954_s30 = smov 0  }
   0x4 LB: > { %6212 = sst [smem:[#allocation6_spill]] %s4845_s25  ;;  %s3640_s14 = sadd.s32 4294967295, %s4865_s30   ;;  %s4865_s30 = sphi %s4954_s30, %s26_s30   ;;  %s4861_s29 = sphi %s4952_s29, %s6326_s29   ;;  %s4857_s28 = sphi %s4950_s28, %s6322_s28   ;;  %s4853_s27 = sphi %s4948_s27, %s6321_s27   ;;  %s4849_s26 = sphi %s4946_s26, %s6325_s26   ;;  %s4845_s25 = sphi %s4944_s25, %s6324_s25  }
   0x5   : > { %6213 = sst [smem:[#allocation7_spill]] %s4853_s27  ;;  %s3641_s15 = sadd.s32 4294967294, %s4865_s30  }
   0x6   : > { %6214 = sst [smem:[#allocation8_spill]] %s4861_s29  ;;  %s38_s16 = sadd.s32 1, %s4861_s29 }
   0x7   : > { %s332_s17 = sadd.s32 1, %s4853_s27  ;;  %p40_p0 = scmp.ge.s32.totalorder %s38_s16, 2 }
   0x8   : > { %p342_p1 = scmp.ne.s32.totalorder %s4853_s27, %s4849_s26  ;;  %p343_p2 = scmp.eq.s32.totalorder %s3640_s14, 1 }
   0x9   : > { %p348_p3 = scmp.ne.s32.totalorder %s4849_s26, %s4845_s25  ;;  %s6328_s16 = smov (%p40_p0, %s38_s16), 0 }
   0xa   : > { %6215 = sst [smem:[#allocation9_spill]] %s6328_s16  ;;  %p4984_p4 = por %p343_p2, %p342_p1 }
   0xb   : > { %p349_p5 = scmp.eq.s32.totalorder %s3641_s15, 1  ;;  %s327_s19 = ssub.s32 %s4861_s29, %s6328_s16 }
   0xc   : > { %p3644_p6 = scmp.ge.s32.totalorder %s4865_s30, 1  ;;  %p330_p7 = scmp.eq.s32.totalorder %s327_s19, 0 }
   0xd   : > { %p4991_p8 = por %p349_p5, %p348_p3  ;;  %p419_p9 = scmp.lt.s32.totalorder %s4865_s30, 3 }
   0xe   : > { %s4997_s21 = scalar_select %p330_p7, %s4853_s27, %s332_s17  }
   0xf   : > { %s6217_s20 = scalar_select %p4991_p8, 1, 0 }
  0x10   : > { %6219 = sst [smem:[#allocation11_spill]] %s4997_s21  ;;  %p420_p10 = pnand %p3644_p6, %p419_p9 }
  0x11   : > { %6218 = sst [smem:[#allocation10_spill]] %s6217_s20 }
  0x12   : > { %423 = sbr.rel (%p420_p10) target bundleno = 2061 (0x80d), region = 72 }
  0x19   : > { %p471_p11 = scmp.lt.s32.totalorder %s4857_s28, 1  ;;  %v4509_v0 = vld [vmem:[%s6146_s4 + $0x10] sm:$0xff]   ;;  %vm587_vm0 = vcmask 261120   ;;  %v4867_v1 = vmov 0   ;;  %v678_v2 = vld [vmem:[%s6145_s3] sm:$0xff]  ;;  %v679_v4 = vld [vmem:[%s6145_s3 + $0x8] sm:$0xff] }
  0x1a   : > { %4004 = vmatprep.mubr.msk.bf16.mxu1 %vm587_vm0, %v4509_v0  ;;  %4505 = vset.pattern.permute.xlu0 %v4867_v1  ;;  %v507_v3 = vld [vmem:[%s6147_s5] sm:$0xff]  ;;  %v508_v5 = vld [vmem:[%s6147_s5 + $0x8] sm:$0xff]  ;;  %v680_v10 = vld [vmem:[%s6145_s3 + $0x10] sm:$0xff]  ;;  %vm665_vm1 = vcmask 130048   ;;  %vm808_vm2 = vcmask 64512   ;;  %vm4869_vm3 = vmmov 0  }
  0x1b   : > { %s472_s24 = scalar_select %p471_p11, %s4857_s28, 1  ;;  %4506 = vset.pattern.permute.xlu1 %v4867_v1  ;;  %684 = vperm.xlu0 %4505, %v678_v2   ;;  %v681_v12 = vld [vmem:[%s6145_s3 + $0x18] sm:$0xff]  ;;  %v4513_v15 = vld [vmem:[%s6146_s4] sm:$0xff]   ;;  %v4514_v18 = vld [vmem:[%s6146_s4 + $0x8] sm:$0xff]   ;;  %vm3471_vm5 = vcmask 523264  }
  0x1c   : > { %517 = vperm.xlu1 %4506, %v507_v3   ;;  %v4510_v13 = vld [vmem:[%s6146_s4 + $0x18] sm:$0xff]   ;;  %v4511_v17 = vld [vmem:[%s6144_s2] sm:$0xff]   ;;  %4000 = vmatprep.mubr.msk.bf16.mxu0 %vm587_vm0, %v4513_v15  ;;  %v4512_v20 = vld [vmem:[%s6144_s2 + $0x8] sm:$0xff]   ;;  %s468_s29 = sand.u32 1, %s4849_s26   ;;  %s3827_s21 = sshll.u32 %s4857_s28, 9 }
  0x1d   : > { %s3826_s14 = sshll.u32 %s472_s24, 4  ;;  %s3825_s15 = sshll.u32 %s472_s24, 5  ;;  %v510_v43 = vld [vmem:[%s6147_s5 + $0x18] sm:$0xff]  ;;  %v509_v44 = vld [vmem:[%s6147_s5 + $0x10] sm:$0xff]  ;;  %vm5802_vm4 = vmpackc.low %vm665_vm1, %vm665_vm1 }
  0x1e   : > { %s483_s23 = scalar_lea.vmem %s6143_s1, %s3826_s14  ;;  %s5017_s25 = scalar_lea.vmem %s6142_s0, %s3825_s15 }
  0x1f   : > { %v4507_v6 = vld [vmem:[%s483_s23] sm:$0xff]   ;;  %v4508_v7 = vld [vmem:[%s483_s23 + $0x8] sm:$0xff]   ;;  %v487_v11 = vld [vmem:[%s5017_s25 + $0x10] sm:$0xff]  ;;  %689 = vperm.xlu0 %4505, %v679_v4   ;;  %s3645_s16 = sshll.u32 %s468_s29, 5  ;;  %s6092_s17 = scalar_lea.hbm %s6155_s13, %s3827_s21 }
  0x20   : > { %4432 = vmatprep.subr.bf16.mxu1 %v4507_v6  ;;  %v485_v8 = vld [vmem:[%s5017_s25] sm:$0xff]  ;;  %v486_v9 = vld [vmem:[%s5017_s25 + $0x8] sm:$0xff]  ;;  %3996 = vmatprep.subr.bf16.mxu0 %v4507_v6  ;;  %v488_v16 = vld [vmem:[%s5017_s25 + $0x18] sm:$0xff]  ;;  %s470_s27 = scalar_lea.vmem [#allocation3], %s3645_s16  ;;  %s6096_s28 = scalar_lea.sflag [#allocation4], %s468_s29 }
  0x21   : > { %4434 = vmatpush3.bf16.msra.mxu1 %v4507_v6  ;;  %v5037_v14 = vpack.c.bf16 %v486_v9, %v485_v8  ;;  %522 = vperm.xlu1 %4506, %v508_v5   ;;  %v5051_v19 = vpack.c.bf16 %v488_v16, %v487_v11  ;;  %s3550_s20 = sshll.u32 %s470_s27, 4  ;;  %s4871_s23 = smov [#allocation3]   ;;  %s6085_s20 = int_to_ptr.vmem [resolvable:$true] %s3550_s20 }
  0x22   : > { %4433 = vmatprep.subr.bf16.mxu1 %v4508_v7  ;;  %3997 = vmatpush3.bf16.msra.mxu0 %v4507_v6  ;;  %s4787_s22 = scalar_lea.vmem %s6085_s20, 512  ;;  %s4791_s24 = sshll.u32 %s4871_s23, 4  ;;  %s4792_s24 = int_to_ptr.vmem [resolvable:$false] %s4791_s24 }
  0x23   : > { %6220 = vst [vmem:[#allocation12_spill] sm:$0xff] %v5037_v14  ;;  %3998 = vmatprep.subr.bf16.mxu0 %v4508_v7  ;;  %694 = vperm.xlu0 %4505, %v680_v10   ;;  %6221 = vst [vmem:[#allocation13_spill] sm:$0xff] %v5051_v19  ;;  %p4788_p12 = scmp.ne.s32.totalorder %s6085_s20, %s4787_s22  ;;  %p4794_p1 = scmp.lt.s32.totalorder %s6085_s20, %s4792_s24 }
  0x25   : > { %4435 = vmatpush3.bf16.msra.mxu1 %v4508_v7  ;;  %699 = vperm.xlu1 %4506, %v681_v12   ;;  %p4789_p13 = pnand %p4788_p12, %p4984_p4 }
  0x26   : > { %4008 = vmatprep.subr.bf16.mxu1 %v5037_v14  ;;  %3999 = vmatpush3.bf16.msra.mxu0 %v4508_v7 }
  0x27   : > { %p4790_p0 = pneg %p4789_p13 }
  0x28   : > { %4005 = vmatmul.mubr.msk.bf16.vlgmr.msra.gmra.mrb[0].mxu1 %vm587_vm0, %v4510_v13 }
  0x29   : > { %4009 = vmatpush3.bf16.msra.mxu1 %v5037_v14  ;;  %4012 = vmatprep.mubr.msk.bf16.mxu1 %vm587_vm0, %v4511_v17 }
  0x2a   : > { %4010 = vmatprep.subr.bf16.mxu1 %v5051_v19  ;;  %4001 = vmatmul.mubr.msk.bf16.vlgmr.msra.gmra.mrb[0].mxu0 %vm587_vm0, %v4514_v18 }
  0x2d   : > { %4011 = vmatpush3.bf16.msra.mxu1 %v5051_v19 }
  0x30   : > { %4013 = vmatmul.mubr.msk.bf16.vlgmr.msra.gmra.mrb[4].mxu1 %vm587_vm0, %v4512_v20 }
  0x9a   : > { %v685_v28 = vpop.permute.xlu0 %684 }
  0x9b   : > { %v518_v21 = vpop.permute.xlu1 %517 }
  0x9e   : > { %v690_v38 = vpop.permute.xlu0 %689 }
  0xa0   : > { %v523_v31 = vpop.permute.xlu1 %522 }
  0xa2   : > { %v695_v45 = vpop.permute.xlu0 %694 }
  0xa4   : > { %v700_v46 = vpop.permute.xlu1 %699 }
  0xfb   : > { %v5063_v22 = vpop.f32.mrb[0].mxu1 }
  0xfc   : > { %6222 = vst [vmem:[#allocation14_spill] sm:$0xff] %v5063_v22  ;;  %v5065_v23 = vpop.f32.mrb[1].mxu1 }
  0xfd   : > { %v5067_v24 = vpop.f32.mrb[2].mxu1  ;;  %v5069_v25 = vpop.f32.mrb[0].mxu0 }
  0xfe   : > { %6223 = vst [vmem:[#allocation15_spill] sm:$0xff] %v5067_v24  ;;  %v5071_v26 = vpop.f32.mrb[3].mxu1  ;;  %v634_v27 = vpop.f32.mrb[1].mxu0 }
  0xff   : > { %v635_v29 = vadd.f32 %v634_v27, %v518_v21  ;;  %v5073_v30 = vpop.f32.mrb[2].mxu0  ;;  %v511_v21 = vld [vmem:[%s6147_s5 + $0x20] sm:$0xff] }
 0x100   : > { %v637_v32 = vpop.f32.mrb[3].mxu0 }
 0x101   : > { %666 = vst.msk [vmem:[#allocation2] sm:$0xff] %vm665_vm1, %v635_v29  ;;  %v638_v33 = vadd.f32 %v637_v32, %v523_v31  ;;  %v512_v31 = vld [vmem:[%s6147_s5 + $0x28] sm:$0xff] }
 0x103   : > { %v4014_v34 = vpop.f32.mrb[4].mxu1  ;;  %667 = vst.msk [vmem:[#allocation2 + $0x8] sm:$0xff] %vm665_vm1, %v638_v33 }
 0x104   : > { %v753_v35 = vpop.f32.mrb[5].mxu1  ;;  %v762_v48 = vadd.f32 %v4014_v34, %v695_v45 }
 0x105   : > { %v754_v36 = vadd.f32 %v753_v35, %v685_v28  ;;  %v4015_v37 = vpop.f32.mrb[6].mxu1 }
 0x106   : > { %v756_v39 = vpop.f32.mrb[7].mxu1  ;;  %v765_v50 = vadd.f32 %v4015_v37, %v700_v46 }
 0x107   : > { %v757_v40 = vadd.f32 %v756_v39, %v690_v38  ;;  %776 = vxpose.xlu0.b32.start.end [1/1] (short) %v754_v36, 128 }
 0x108   : > { %v768_v41 = vld [vmem:[#allocation2] sm:$0xff] }
 0x109   : > { %1002 = vxpose.xlu1.b32.start.end [1/1] (short) %v757_v40, 128  ;;  %4016 = vmatprep.subr.mxu1 %v768_v41 }
 0x10a   : > { %v769_v42 = vld [vmem:[#allocation2 + $0x8] sm:$0xff]  ;;  %4017 = vmatpush3.msra.mxu1 %v768_v41 }
 0x10b   : > { %4042 = vmatprep.subr.mxu0 %v769_v42 }
 0x10c   : > { %4043 = vmatpush3.msra.mxu0 %v769_v42 }
 0x163   : > { %532 = vperm.xlu1 %4506, %v510_v43  }
 0x16c   : > { %527 = vperm.xlu0 %4505, %v509_v44  }
 0x187   : > { %v792_v47 = vpop.trf.xlu0 }
 0x188   : > { %4018 = vmatprep.mubr.msk.f32.mxu1 %vm808_vm2, %v792_v47 }
 0x189   : > { %v1018_v49 = vpop.trf.xlu1 }
 0x18a   : > { %1227 = vxpose.xlu0.b32.start.end [1/1] (short) %v762_v48, 128  ;;  %4044 = vmatprep.mubr.msk.f32.mxu0 %vm808_vm2, %v1018_v49 }
 0x18b   : > { %v793_v51 = vpop.trf.xlu0 }
 0x18c   : > { %1452 = vxpose.xlu1.b32.start.end [1/1] (short) %v765_v50, 128  ;;  %4019 = vmatmul.mubr.msk.f32.vlgmr.msra.gmra.mrb[8].mxu1 %vm808_vm2, %v793_v51 }
 0x18d   : > { %v1019_v52 = vpop.trf.xlu1 }
 0x18e   : > { %4045 = vmatmul.mubr.msk.f32.vlgmr.msra.gmra.mrb[4].mxu0 %vm808_vm2, %v1019_v52 }
 0x18f   : > { %v794_v53 = vpop.trf.xlu0 }
 0x190   : > { %4021 = vmatprep.mubr.msk.f32.mxu1 %vm808_vm2, %v794_v53 }
 0x191   : > { %v1020_v54 = vpop.trf.xlu1 }
 0x192   : > { %4047 = vmatprep.mubr.msk.f32.mxu0 %vm808_vm2, %v1020_v54 }
 0x193   : > { %v795_v55 = vpop.trf.xlu0 }
 0x194   : > { %4022 = vmatmul.mubr.msk.f32.gmra.mrb[10].mxu1 %vm808_vm2, %v795_v55 }
 0x195   : > { %v1021_v56 = vpop.trf.xlu1 }
 0x196   : > { %4048 = vmatmul.mubr.msk.f32.gmra.mrb[6].mxu0 %vm808_vm2, %v1021_v56 }
 0x197   : > { %v796_v57 = vpop.trf.xlu0 }
 0x198   : > { %4024 = vmatprep.mubr.msk.f32.mxu1 %vm808_vm2, %v796_v57 }
 0x199   : > { %v1022_v58 = vpop.trf.xlu1 }
 0x19a   : > { %4050 = vmatprep.mubr.msk.f32.mxu0 %vm808_vm2, %v1022_v58 }
 0x19b   : > { %v797_v59 = vpop.trf.xlu0 }
 0x19c   : > { %4025 = vmatmul.mubr.msk.f32.gmra.mrb[12].mxu1 %vm808_vm2, %v797_v59 }
 0x19d   : > { %v1023_v60 = vpop.trf.xlu1 }
 0x19e   : > { %4051 = vmatmul.mubr.msk.f32.gmra.mrb[8].mxu0 %vm808_vm2, %v1023_v60 }
 0x19f   : > { %v798_v61 = vpop.trf.xlu0 }
 0x1a0   : > { %4027 = vmatprep.mubr.msk.f32.mxu1 %vm808_vm2, %v798_v61 }
 0x1a1   : > { %v1024_v62 = vpop.trf.xlu1 }
 0x1a2   : > { %4053 = vmatprep.mubr.msk.f32.mxu0 %vm808_vm2, %v1024_v62 }
 0x1a3   : > { %v799_v63 = vpop.trf.xlu0 }
 0x1a4   : > { %4028 = vmatmul.mubr.msk.f32.gmra.mrb[14].mxu1 %vm808_vm2, %v799_v63 }
 0x1a5   : > { %v1025_v0 = vpop.trf.xlu1 }
 0x1a6   : > { %4054 = vmatmul.mubr.msk.f32.gmra.mrb[10].mxu0 %vm808_vm2, %v1025_v0 }
 0x1a7   : > { %v800_v1 = vpop.trf.xlu0 }
 0x1a8   : > { %4030 = vmatprep.mubr.msk.f32.mxu1 %vm808_vm2, %v800_v1 }
 0x1a9   : > { %v1026_v2 = vpop.trf.xlu1 }
 0x1aa   : > { %4056 = vmatprep.mubr.msk.f32.mxu0 %vm808_vm2, %v1026_v2 }
 0x1ab   : > { %v801_v3 = vpop.trf.xlu0 }
 0x1ac   : > { %4031 = vmatmul.mubr.msk.f32.gmra.mrb[16].mxu1 %vm808_vm2, %v801_v3 }
 0x1ad   : > { %v1027_v4 = vpop.trf.xlu1 }
 0x1ae   : > { %4057 = vmatmul.mubr.msk.f32.gmra.mrb[12].mxu0 %vm808_vm2, %v1027_v4 }
 0x1af   : > { %v802_v5 = vpop.trf.xlu0 }
 0x1b0   : > { %4033 = vmatprep.mubr.msk.f32.mxu1 %vm808_vm2, %v802_v5 }
 0x1b1   : > { %v1028_v6 = vpop.trf.xlu1 }
 0x1b2   : > { %4059 = vmatprep.mubr.msk.f32.mxu0 %vm808_vm2, %v1028_v6 }
 0x1b3   : > { %v803_v7 = vpop.trf.xlu0 }
 0x1b4   : > { %4034 = vmatmul.mubr.msk.f32.gmra.mrb[18].mxu1 %vm808_vm2, %v803_v7 }
 0x1b5   : > { %v1029_v8 = vpop.trf.xlu1 }
 0x1b6   : > { %4060 = vmatmul.mubr.msk.f32.gmra.mrb[14].mxu0 %vm808_vm2, %v1029_v8 }
 0x1b7   : > { %v804_v9 = vpop.trf.xlu0 }
 0x1b8   : > { %4036 = vmatprep.mubr.msk.f32.mxu1 %vm808_vm2, %v804_v9 }
 0x1b9   : > { %v1030_v10 = vpop.trf.xlu1 }
 0x1ba   : > { %4062 = vmatprep.mubr.msk.f32.mxu0 %vm808_vm2, %v1030_v10 }
 0x1bb   : > { %v805_v11 = vpop.trf.xlu0 }
 0x1bc   : > { %4037 = vmatmul.mubr.msk.f32.gmra.mrb[20].mxu1 %vm808_vm2, %v805_v11 }
 0x1bd   : > { %v1031_v12 = vpop.trf.xlu1 }
 0x1be   : > { %4063 = vmatmul.mubr.msk.f32.gmra.mrb[16].mxu0 %vm808_vm2, %v1031_v12 }
 0x1bf   : > { %v806_v13 = vpop.trf.xlu0 }
 0x1c0   : > { %4039 = vmatprep.mubr.msk.f32.mxu1 %vm808_vm2, %v806_v13 }
 0x1c1   : > { %v1032_v15 = vpop.trf.xlu1 }
 0x1c2   : > { %4065 = vmatprep.mubr.msk.f32.mxu0 %vm808_vm2, %v1032_v15 }
 0x1c3   : > { %v807_v16 = vpop.trf.xlu0 }
 0x1c4   : > { %4040 = vmatmul.mubr.msk.f32.gmra.mrb[22].mxu1 %vm808_vm2, %v807_v16 }
 0x1c5   : > { %v1033_v17 = vpop.trf.xlu1 }
 0x1c6   : > { %4066 = vmatmul.mubr.msk.f32.gmra.mrb[18].mxu0 %vm808_vm2, %v1033_v17 }
 0x1e2   : > { %v533_v18 = vpop.permute.xlu1 %532 }
 0x1e3   : > { %v646_v20 = vadd.f32 %v5073_v30, %v533_v18 }
 0x1e5   : > { %669 = vst.msk [vmem:[#allocation2 + $0x18] sm:$0xff] %vm665_vm1, %v646_v20 }
 0x1e6   : > { %537 = vperm.xlu1 %4506, %v511_v21  }
 0x1eb   : > { %v528_v27 = vpop.permute.xlu0 %527 }
 0x1ec   : > { %v643_v28 = vadd.f32 %v5069_v25, %v528_v27  ;;  %v771_v29 = vld [vmem:[#allocation2 + $0x18] sm:$0xff] }
 0x1ed   : > { %4094 = vmatprep.subr.mxu0 %v771_v29 }
 0x1ee   : > { %668 = vst.msk [vmem:[#allocation2 + $0x10] sm:$0xff] %vm665_vm1, %v643_v28  ;;  %4095 = vmatpush3.msra.mxu0 %v771_v29 }
 0x1ef   : > { %542 = vperm.xlu0 %4505, %v512_v31  }
 0x1f5   : > { %v770_v30 = vld [vmem:[#allocation2 + $0x10] sm:$0xff] }
 0x1f6   : > { %4068 = vmatprep.subr.mxu1 %v770_v30 }
 0x1f7   : > { %4069 = vmatpush3.msra.mxu1 %v770_v30 }
 0x20a   : > { %v1243_v32 = vpop.trf.xlu0 }
 0x20b   : > { %4070 = vmatprep.mubr.msk.f32.mxu1 %vm808_vm2, %v1243_v32 }
 0x20c   : > { %v1468_v33 = vpop.trf.xlu1 }
 0x20d   : > { %4096 = vmatprep.mubr.msk.f32.mxu0 %vm808_vm2, %v1468_v33 }
 0x20e   : > { %v1244_v25 = vpop.trf.xlu0 }
 0x20f   : > { %4071 = vmatmul.mubr.msk.f32.vlgmr.msra.gmra.mrb[24].mxu1 %vm808_vm2, %v1244_v25 }
 0x210   : > { %v1469_v34 = vpop.trf.xlu1 }
 0x211   : > { %4097 = vmatmul.mubr.msk.f32.vlgmr.msra.gmra.mrb[20].mxu0 %vm808_vm2, %v1469_v34 }
 0x212   : > { %v1245_v35 = vpop.trf.xlu0 }
 0x213   : > { %4073 = vmatprep.mubr.msk.f32.mxu1 %vm808_vm2, %v1245_v35 }
 0x214   : > { %v1470_v36 = vpop.trf.xlu1 }
 0x215   : > { %4099 = vmatprep.mubr.msk.f32.mxu0 %vm808_vm2, %v1470_v36 }
 0x216   : > { %v1246_v37 = vpop.trf.xlu0 }
 0x217   : > { %4074 = vmatmul.mubr.msk.f32.gmra.mrb[26].mxu1 %vm808_vm2, %v1246_v37 }
 0x218   : > { %v1471_v38 = vpop.trf.xlu1 }
 0x219   : > { %4100 = vmatmul.mubr.msk.f32.gmra.mrb[22].mxu0 %vm808_vm2, %v1471_v38 }
 0x21a   : > { %v1247_v39 = vpop.trf.xlu0 }
 0x21b   : > { %4076 = vmatprep.mubr.msk.f32.mxu1 %vm808_vm2, %v1247_v39 }
 0x21c   : > { %v1472_v40 = vpop.trf.xlu1 }
 0x21d   : > { %4102 = vmatprep.mubr.msk.f32.mxu0 %vm808_vm2, %v1472_v40 }
 0x21e   : > { %v1248_v41 = vpop.trf.xlu0 }
 0x21f   : > { %4077 = vmatmul.mubr.msk.f32.gmra.mrb[28].mxu1 %vm808_vm2, %v1248_v41 }
 0x220   : > { %v1473_v42 = vpop.trf.xlu1 }
 0x221   : > { %4103 = vmatmul.mubr.msk.f32.gmra.mrb[24].mxu0 %vm808_vm2, %v1473_v42 }
 0x222   : > { %v1249_v43 = vpop.trf.xlu0 }
 0x223   : > { %4079 = vmatprep.mubr.msk.f32.mxu1 %vm808_vm2, %v1249_v43 }
 0x224   : > { %v1474_v44 = vpop.trf.xlu1 }
 0x225   : > { %4105 = vmatprep.mubr.msk.f32.mxu0 %vm808_vm2, %v1474_v44 }
 0x226   : > { %v1250_v45 = vpop.trf.xlu0 }
 0x227   : > { %4080 = vmatmul.mubr.msk.f32.gmra.mrb[30].mxu1 %vm808_vm2, %v1250_v45 }
 0x228   : > { %v1475_v46 = vpop.trf.xlu1 }
 0x229   : > { %4106 = vmatmul.mubr.msk.f32.gmra.mrb[26].mxu0 %vm808_vm2, %v1475_v46 }
 0x22a   : > { %v1251_v47 = vpop.trf.xlu0 }
 0x22b   : > { %4082 = vmatprep.mubr.msk.f32.mxu1 %vm808_vm2, %v1251_v47 }
 0x22c   : > { %v1476_v48 = vpop.trf.xlu1 }
 0x22d   : > { %4108 = vmatprep.mubr.msk.f32.mxu0 %vm808_vm2, %v1476_v48 }
 0x22e   : > { %v1252_v49 = vpop.trf.xlu0 }
 0x22f   : > { %4083 = vmatmul.mubr.msk.f32.gmra.mrb[32].mxu1 %vm808_vm2, %v1252_v49 }
 0x230   : > { %v1477_v50 = vpop.trf.xlu1 }
 0x231   : > { %4109 = vmatmul.mubr.msk.f32.gmra.mrb[28].mxu0 %vm808_vm2, %v1477_v50 }
 0x232   : > { %v1253_v51 = vpop.trf.xlu0 }
 0x233   : > { %4085 = vmatprep.mubr.msk.f32.mxu1 %vm808_vm2, %v1253_v51 }
 0x234   : > { %v1478_v52 = vpop.trf.xlu1 }
 0x235   : > { %4111 = vmatprep.mubr.msk.f32.mxu0 %vm808_vm2, %v1478_v52 }
 0x236   : > { %v1254_v53 = vpop.trf.xlu0 }
 0x237   : > { %4086 = vmatmul.mubr.msk.f32.gmra.mrb[34].mxu1 %vm808_vm2, %v1254_v53 }
 0x238   : > { %v1479_v54 = vpop.trf.xlu1 }
 0x239   : > { %4112 = vmatmul.mubr.msk.f32.gmra.mrb[30].mxu0 %vm808_vm2, %v1479_v54 }
 0x23a   : > { %v1255_v55 = vpop.trf.xlu0 }
 0x23b   : > { %4088 = vmatprep.mubr.msk.f32.mxu1 %vm808_vm2, %v1255_v55 }
 0x23c   : > { %v1480_v56 = vpop.trf.xlu1 }
 0x23d   : > { %4114 = vmatprep.mubr.msk.f32.mxu0 %vm808_vm2, %v1480_v56 }
 0x23e   : > { %v1256_v57 = vpop.trf.xlu0 }
 0x23f   : > { %4089 = vmatmul.mubr.msk.f32.gmra.mrb[36].mxu1 %vm808_vm2, %v1256_v57 }
 0x240   : > { %v1481_v58 = vpop.trf.xlu1 }
 0x241   : > { %4115 = vmatmul.mubr.msk.f32.gmra.mrb[32].mxu0 %vm808_vm2, %v1481_v58 }
 0x242   : > { %v1257_v59 = vpop.trf.xlu0 }
 0x243   : > { %4091 = vmatprep.mubr.msk.f32.mxu1 %vm808_vm2, %v1257_v59 }
 0x244   : > { %v1482_v60 = vpop.trf.xlu1 }
 0x245   : > { %4117 = vmatprep.mubr.msk.f32.mxu0 %vm808_vm2, %v1482_v60 }
 0x246   : > { %v1258_v61 = vpop.trf.xlu0 }
 0x247   : > { %4092 = vmatmul.mubr.msk.f32.gmra.mrb[38].mxu1 %vm808_vm2, %v1258_v61 }
 0x248   : > { %v1483_v62 = vpop.trf.xlu1 }
 0x249   : > { %4118 = vmatmul.mubr.msk.f32.gmra.mrb[34].mxu0 %vm808_vm2, %v1483_v62 }
 0x25f   : > { %v5157_v63 = vpop.f32.mrb[8].mxu1 }
 0x260   : > { %v5159_v0 = vpop.f32.mrb[9].mxu1  ;;  %v1681_v1 = vsel %vm665_vm1, %v5157_v63, -inf }
 0x261   : > { %1682 = vmax.xlane.f32.xlu1 %v1681_v1  ;;  %v1678_v2 = vsel %vm665_vm1, %v5159_v0, -inf  ;;  %v5165_v3 = vpop.f32.mrb[4].mxu0 }
 0x262   : > { %1679 = vmax.xlane.f32.xlu0 %v1678_v2  ;;  %v5167_v4 = vpop.f32.mrb[5].mxu0  ;;  %v1729_v5 = vsel %vm665_vm1, %v5165_v3, -inf }
 0x263   : > { %v1726_v9 = vsel %vm665_vm1, %v5167_v4, -inf }
 0x265   : > { %v538_v6 = vpop.permute.xlu1 %537 }
 0x266   : > { %v651_v7 = vadd.f32 %v5065_v23, %v538_v6  ;;  %1730 = vmax.xlane.f32.xlu0 %v1729_v5 }
 0x267   : > { %v5172_v8 = vpop.f32.mrb[10].mxu1 }
 0x268   : > { %670 = vst.msk [vmem:[#allocation2 + $0x20] sm:$0xff] %vm665_vm1, %v651_v7  ;;  %v5177_v10 = vpop.f32.mrb[11].mxu1  ;;  %v1687_v23 = vsel %vm665_vm1, %v5172_v8, -inf }
 0x269   : > { %v1684_v11 = vsel %vm665_vm1, %v5177_v10, -inf  ;;  %v5181_v12 = vpop.f32.mrb[6].mxu0 }
 0x26a   : > { %1727 = vmax.xlane.f32.xlu0 %v1726_v9  ;;  %1685 = vmax.xlane.f32.xlu1 %v1684_v11  ;;  %v5183_v13 = vpop.f32.mrb[7].mxu0  ;;  %v1735_v20 = vsel %vm665_vm1, %v5181_v12, -inf }
 0x26b   : > { %v1732_v15 = vsel %vm665_vm1, %v5183_v13, -inf }
 0x26e   : > { %1688 = vmax.xlane.f32.xlu0 %v1687_v23  ;;  %1733 = vmax.xlane.f32.xlu1 %v1732_v15  ;;  %v543_v16 = vpop.permute.xlu0 %542 }
 0x26f   : > { %v654_v17 = vadd.f32 %v5071_v26, %v543_v16  ;;  %v5190_v18 = vpop.f32.mrb[12].mxu1 }
 0x270   : > { %v5194_v21 = vpop.f32.mrb[13].mxu1  ;;  %v1693_v26 = vsel %vm665_vm1, %v5190_v18, -inf }
 0x271   : > { %671 = vst.msk [vmem:[#allocation2 + $0x28] sm:$0xff] %vm665_vm1, %v654_v17  ;;  %v1690_v27 = vsel %vm665_vm1, %v5194_v21, -inf  ;;  %v5199_v28 = vpop.f32.mrb[8].mxu0 }
 0x272   : > { %1736 = vmax.xlane.f32.xlu0 %v1735_v20  ;;  %1691 = vmax.xlane.f32.xlu1 %v1690_v27  ;;  %v5201_v29 = vpop.f32.mrb[9].mxu0  ;;  %v1741_v32 = vsel %vm665_vm1, %v5199_v28, -inf }
 0x273   : > { %v1738_v31 = vsel %vm665_vm1, %v5201_v29, -inf }
 0x276   : > { %1694 = vmax.xlane.f32.xlu0 %v1693_v26  ;;  %1739 = vmax.xlane.f32.xlu1 %v1738_v31 }
 0x277   : > { %v5207_v30 = vpop.f32.mrb[14].mxu1 }
 0x278   : > { %v5211_v33 = vpop.f32.mrb[15].mxu1  ;;  %v1699_v36 = vsel %vm665_vm1, %v5207_v30, -inf }
 0x279   : > { %v1696_v25 = vsel %vm665_vm1, %v5211_v33, -inf  ;;  %v5215_v34 = vpop.f32.mrb[10].mxu0 }
 0x27a   : > { %1742 = vmax.xlane.f32.xlu0 %v1741_v32  ;;  %1697 = vmax.xlane.f32.xlu1 %v1696_v25  ;;  %v5217_v35 = vpop.f32.mrb[11].mxu0  ;;  %v1747_v39 = vsel %vm665_vm1, %v5215_v34, -inf }
 0x27b   : > { %v1744_v37 = vsel %vm665_vm1, %v5217_v35, -inf }
 0x27e   : > { %1700 = vmax.xlane.f32.xlu0 %v1699_v36  ;;  %1745 = vmax.xlane.f32.xlu1 %v1744_v37 }
 0x27f   : > { %v5223_v38 = vpop.f32.mrb[16].mxu1 }
 0x280   : > { %v5227_v40 = vpop.f32.mrb[17].mxu1  ;;  %v1705_v44 = vsel %vm665_vm1, %v5223_v38, -inf }
 0x281   : > { %v1702_v41 = vsel %vm665_vm1, %v5227_v40, -inf  ;;  %v5231_v42 = vpop.f32.mrb[12].mxu0 }
 0x282   : > { %1748 = vmax.xlane.f32.xlu0 %v1747_v39  ;;  %1703 = vmax.xlane.f32.xlu1 %v1702_v41  ;;  %v5233_v43 = vpop.f32.mrb[13].mxu0  ;;  %v1753_v47 = vsel %vm665_vm1, %v5231_v42, -inf }
 0x283   : > { %v1750_v45 = vsel %vm665_vm1, %v5233_v43, -inf }
 0x286   : > { %1706 = vmax.xlane.f32.xlu0 %v1705_v44  ;;  %1751 = vmax.xlane.f32.xlu1 %v1750_v45 }
 0x287   : > { %v5239_v46 = vpop.f32.mrb[18].mxu1 }
 0x288   : > { %v5243_v48 = vpop.f32.mrb[19].mxu1  ;;  %v1711_v52 = vsel %vm665_vm1, %v5239_v46, -inf }
 0x289   : > { %v1708_v49 = vsel %vm665_vm1, %v5243_v48, -inf  ;;  %v5247_v50 = vpop.f32.mrb[14].mxu0 }
 0x28a   : > { %1754 = vmax.xlane.f32.xlu0 %v1753_v47  ;;  %1709 = vmax.xlane.f32.xlu1 %v1708_v49  ;;  %v5249_v51 = vpop.f32.mrb[15].mxu0  ;;  %v1759_v55 = vsel %vm665_vm1, %v5247_v50, -inf }
 0x28b   : > { %v1756_v53 = vsel %vm665_vm1, %v5249_v51, -inf }
 0x28e   : > { %1712 = vmax.xlane.f32.xlu0 %v1711_v52  ;;  %1757 = vmax.xlane.f32.xlu1 %v1756_v53 }
 0x28f   : > { %v5255_v54 = vpop.f32.mrb[20].mxu1 }
 0x290   : > { %v5259_v56 = vpop.f32.mrb[21].mxu1  ;;  %v1717_v60 = vsel %vm665_vm1, %v5255_v54, -inf }
 0x291   : > { %v1714_v57 = vsel %vm665_vm1, %v5259_v56, -inf  ;;  %v5263_v58 = vpop.f32.mrb[16].mxu0 }
 0x292   : > { %1760 = vmax.xlane.f32.xlu0 %v1759_v55  ;;  %1715 = vmax.xlane.f32.xlu1 %v1714_v57  ;;  %v5265_v59 = vpop.f32.mrb[17].mxu0  ;;  %v1765_v1 = vsel %vm665_vm1, %v5263_v58, -inf }
 0x293   : > { %v1762_v61 = vsel %vm665_vm1, %v5265_v59, -inf }
 0x296   : > { %1718 = vmax.xlane.f32.xlu0 %v1717_v60  ;;  %1763 = vmax.xlane.f32.xlu1 %v1762_v61 }
 0x297   : > { %v5271_v62 = vpop.f32.mrb[22].mxu1 }
 0x298   : > { %v5275_v2 = vpop.f32.mrb[23].mxu1  ;;  %v1723_v9 = vsel %vm665_vm1, %v5271_v62, -inf }
 0x299   : > { %v1720_v5 = vsel %vm665_vm1, %v5275_v2, -inf  ;;  %v5279_v6 = vpop.f32.mrb[18].mxu0 }
 0x29a   : > { %1766 = vmax.xlane.f32.xlu0 %v1765_v1  ;;  %1721 = vmax.xlane.f32.xlu1 %v1720_v5  ;;  %v5281_v7 = vpop.f32.mrb[19].mxu0  ;;  %v1771_v23 = vsel %vm665_vm1, %v5279_v6, -inf }
 0x29b   : > { %v1768_v11 = vsel %vm665_vm1, %v5281_v7, -inf }
 0x29e   : > { %1724 = vmax.xlane.f32.xlu0 %v1723_v9  ;;  %1769 = vmax.xlane.f32.xlu1 %v1768_v11 }
 0x2a2   : > { %1772 = vmax.xlane.f32.xlu0 %v1771_v23 }
 0x2e2   : > { %v5289_v15 = vpop.f32.mrb[24].mxu1 }
 0x2e3   : > { %v5291_v16 = vpop.f32.mrb[25].mxu1  ;;  %v1777_v17 = vsel %vm665_vm1, %v5289_v15, -inf }
 0x2e4   : > { %1778 = vmax.xlane.f32.xlu0 %v1777_v17  ;;  %v1774_v20 = vsel %vm665_vm1, %v5291_v16, -inf  ;;  %v5297_v27 = vpop.f32.mrb[20].mxu0 }
 0x2e5   : > { %1775 = vmax.xlane.f32.xlu1 %v1774_v20  ;;  %v5299_v26 = vpop.f32.mrb[21].mxu0  ;;  %v1825_v31 = vsel %vm665_vm1, %v5297_v27, -inf }
 0x2e6   : > { %v1822_v32 = vsel %vm665_vm1, %v5299_v26, -inf }
 0x2e8   : > { %1826 = vmax.xlane.f32.xlu0 %v1825_v31 }
 0x2e9   : > { %1823 = vmax.xlane.f32.xlu1 %v1822_v32 }
 0x2ea   : > { %v5305_v25 = vpop.f32.mrb[26].mxu1 }
 0x2eb   : > { %v5307_v36 = vpop.f32.mrb[27].mxu1  ;;  %v1783_v37 = vsel %vm665_vm1, %v5305_v25, -inf }
 0x2ec   : > { %1784 = vmax.xlane.f32.xlu0 %v1783_v37  ;;  %v1780_v39 = vsel %vm665_vm1, %v5307_v36, -inf  ;;  %v5313_v41 = vpop.f32.mrb[22].mxu0 }
 0x2ed   : > { %1781 = vmax.xlane.f32.xlu1 %v1780_v39  ;;  %v5315_v44 = vpop.f32.mrb[23].mxu0  ;;  %v1831_v45 = vsel %vm665_vm1, %v5313_v41, -inf }
 0x2ee   : > { %v1828_v47 = vsel %vm665_vm1, %v5315_v44, -inf  ;;  %v1683_v9 = vpop.xlane.xlu1 %1682 }
 0x2ef   : > { %v5321_v49 = vpop.xlane.xlu0 %1679 }
 0x2f0   : > { %1832 = vmax.xlane.f32.xlu0 %v1831_v45 }
 0x2f1   : > { %1829 = vmax.xlane.f32.xlu1 %v1828_v47 }
 0x2f2   : > { %v5323_v52 = vpop.f32.mrb[28].mxu1 }
 0x2f3   : > { %v5325_v53 = vpop.f32.mrb[29].mxu1  ;;  %v5327_v55 = vpop.xlane.xlu0 %1730  ;;  %v1789_v57 = vsel %vm665_vm1, %v5323_v52, -inf }
 0x2f4   : > { %6224 = vst [vmem:[#allocation16_spill] sm:$0xff] %v5325_v53  ;;  %1790 = vmax.xlane.f32.xlu0 %v1789_v57  ;;  %v1786_v60 = vsel %vm665_vm1, %v5325_v53, -inf  ;;  %v5333_v61 = vpop.f32.mrb[24].mxu0 }
 0x2f5   : > { %6225 = vst [vmem:[#allocation17_spill] sm:$0xff] %v5333_v61  ;;  %1787 = vmax.xlane.f32.xlu1 %v1786_v60  ;;  %v5335_v1 = vpop.f32.mrb[25].mxu0  ;;  %v1837_v5 = vsel %vm665_vm1, %v5333_v61, -inf }
 0x2f6   : > { %6226 = vst [vmem:[#allocation18_spill] sm:$0xff] %v5335_v1  ;;  %v1834_v11 = vsel %vm665_vm1, %v5335_v1, -inf }
 0x2f7   : > { %v5341_v23 = vpop.xlane.xlu0 %1727  ;;  %v5343_v17 = vpop.xlane.xlu1 %1685 }
 0x2f8   : > { %1838 = vmax.xlane.f32.xlu0 %v1837_v5 }
 0x2f9   : > { %1835 = vmax.xlane.f32.xlu1 %v1834_v11 }
 0x2fa   : > { %v5345_v20 = vpop.f32.mrb[30].mxu1 }
 0x2fb   : > { %6227 = vst [vmem:[#allocation19_spill] sm:$0xff] %v5345_v20  ;;  %v5347_v31 = vpop.f32.mrb[31].mxu1  ;;  %v1795_v32 = vsel %vm665_vm1, %v5345_v20, -inf  ;;  %v5351_v37 = vpop.xlane.xlu0 %1688 }
 0x2fc   : > { %6228 = vst [vmem:[#allocation20_spill] sm:$0xff] %v5347_v31  ;;  %1796 = vmax.xlane.f32.xlu0 %v1795_v32  ;;  %v1792_v39 = vsel %vm665_vm1, %v5347_v31, -inf  ;;  %v5355_v45 = vpop.f32.mrb[26].mxu0  ;;  %v5363_v5 = vpop.xlane.xlu1 %1733 }
 0x2fd   : > { %6229 = vst [vmem:[#allocation21_spill] sm:$0xff] %v5355_v45  ;;  %1793 = vmax.xlane.f32.xlu1 %v1792_v39  ;;  %v5357_v47 = vpop.f32.mrb[27].mxu0  ;;  %v1843_v57 = vsel %vm665_vm1, %v5355_v45, -inf }
 0x2fe   : > { %6230 = vst [vmem:[#allocation22_spill] sm:$0xff] %v5357_v47  ;;  %v1840_v60 = vsel %vm665_vm1, %v5357_v47, -inf }
 0x2ff   : > { %v5365_v11 = vpop.xlane.xlu0 %1736 }
 0x300   : > { %1844 = vmax.xlane.f32.xlu0 %v1843_v57 }
 0x301   : > { %1841 = vmax.xlane.f32.xlu1 %v1840_v60  ;;  %v5383_v60 = vpop.xlane.xlu1 %1691 }
 0x302   : > { %v5367_v32 = vpop.f32.mrb[32].mxu1 }
 0x303   : > { %6231 = vst [vmem:[#allocation23_spill] sm:$0xff] %v5367_v32  ;;  %v5369_v19 = vpop.f32.mrb[33].mxu1  ;;  %v1801_v39 = vsel %vm665_vm1, %v5367_v32, -inf  ;;  %v5377_v22 = vpop.xlane.xlu0 %1694 }
 0x304   : > { %6232 = vst [vmem:[#allocation24_spill] sm:$0xff] %v5369_v19  ;;  %1802 = vmax.xlane.f32.xlu0 %v1801_v39  ;;  %v1798_v14 = vsel %vm665_vm1, %v5369_v19, -inf  ;;  %v5375_v24 = vpop.f32.mrb[28].mxu0 }
 0x305   : > { %6233 = vst [vmem:[#allocation25_spill] sm:$0xff] %v5375_v24  ;;  %1799 = vmax.xlane.f32.xlu1 %v1798_v14  ;;  %v5379_v47 = vpop.f32.mrb[29].mxu0  ;;  %v1849_v57 = vsel %vm665_vm1, %v5375_v24, -inf  ;;  %v5395_v31 = vpop.xlane.xlu1 %1739 }
 0x306   : > { %6234 = vst [vmem:[#allocation26_spill] sm:$0xff] %v5379_v47  ;;  %v1846_v45 = vsel %vm665_vm1, %v5379_v47, -inf  ;;  %v1871_v47 = vsub.f32 %v5157_v63, %v1683_v9  ;;  %v1886_v63 = vsub.f32 %v5167_v4, %v5341_v23  ;;  %v1873_v4 = vsub.f32 %v5172_v8, %v5351_v37 }
 0x307   : > { %v5389_v19 = vpop.xlane.xlu0 %1742 }
 0x308   : > { %1850 = vmax.xlane.f32.xlu0 %v1849_v57 }
 0x309   : > { %1847 = vmax.xlane.f32.xlu1 %v1846_v45  ;;  %v5414_v61 = vpop.xlane.xlu1 %1697 }
 0x30a   : > { %v5387_v39 = vpop.f32.mrb[34].mxu1 }
 0x30b   : > { %6235 = vst [vmem:[#allocation27_spill] sm:$0xff] %v5387_v39  ;;  %v5391_v32 = vpop.f32.mrb[35].mxu1  ;;  %v1807_v14 = vsel %vm665_vm1, %v5387_v39, -inf  ;;  %v1870_v39 = vsub.f32 %v5159_v0, %v5321_v49 }
 0x30c   : > { %6236 = vst [vmem:[#allocation28_spill] sm:$0xff] %v5391_v32  ;;  %1808 = vmax.xlane.f32.xlu0 %v1807_v14  ;;  %v1804_v24 = vsel %vm665_vm1, %v5391_v32, -inf  ;;  %v5399_v20 = vpop.f32.mrb[30].mxu0  ;;  %v5410_v14 = vpop.xlane.xlu0 %1700  ;;  %v1936_v32 = vmul.f32 1.442695, %v1871_v47 }
 0x30d   : > { %6237 = vst [vmem:[#allocation29_spill] sm:$0xff] %v5399_v20  ;;  %1805 = vmax.xlane.f32.xlu1 %v1804_v24  ;;  %v5401_v57 = vpop.f32.mrb[31].mxu0  ;;  %v1855_v45 = vsel %vm665_vm1, %v5399_v20, -inf  ;;  %v1887_v24 = vsub.f32 %v5165_v3, %v5327_v55  ;;  %v1934_v20 = vmul.f32 1.442695, %v1870_v39  ;;  %v1872_v39 = vsub.f32 %v5177_v10, %v5343_v17 }
 0x30e   : > { %v1852_v1 = vsel %vm665_vm1, %v5401_v57, -inf  ;;  %4527 = vpow2.f32 %v1936_v32  ;;  %v1940_v32 = vmul.f32 1.442695, %v1873_v4 }
 0x30f   : > { %v1968_v47 = vmul.f32 1.442695, %v1887_v24  ;;  %4529 = vpow2.f32 %v1934_v20  ;;  %v1889_v24 = vsub.f32 %v5181_v12, %v5365_v11  ;;  %v1938_v37 = vmul.f32 1.442695, %v1872_v39 }
 0x310   : > { %1856 = vmax.xlane.f32.xlu0 %v1855_v45  ;;  %v1966_v45 = vmul.f32 1.442695, %v1886_v63  ;;  %v1888_v20 = vsub.f32 %v5183_v13, %v5363_v5  ;;  %v1875_v5 = vsub.f32 %v5190_v18, %v5377_v22  ;;  %v1891_v22 = vsub.f32 %v5199_v28, %v5389_v19 }
 0x311   : > { %1853 = vmax.xlane.f32.xlu1 %v1852_v1  ;;  %4531 = vpow2.f32 %v1968_v47  ;;  %v1972_v13 = vmul.f32 1.442695, %v1889_v24  ;;  %v1890_v24 = vsub.f32 %v5201_v29, %v5395_v31  ;;  %v1877_v28 = vsub.f32 %v5207_v30, %v5410_v14 }
 0x312   : > { %v5416_v53 = vpop.f32.mrb[36].mxu1  ;;  %4533 = vpow2.f32 %v1966_v45  ;;  %v1970_v39 = vmul.f32 1.442695, %v1888_v20  ;;  %v1874_v45 = vsub.f32 %v5194_v21, %v5383_v60  ;;  %v1976_v19 = vmul.f32 1.442695, %v1891_v22 }
 0x313   : > { %v5420_v9 = vpop.f32.mrb[37].mxu1  ;;  %v1813_v0 = vsel %vm665_vm1, %v5416_v53, -inf  ;;  %4535 = vpow2.f32 %v1940_v32  ;;  %v1944_v32 = vmul.f32 1.442695, %v1875_v5  ;;  %v1974_v29 = vmul.f32 1.442695, %v1890_v24 }
 0x314   : > { %1814 = vmax.xlane.f32.xlu0 %v1813_v0  ;;  %v1810_v49 = vsel %vm665_vm1, %v5420_v9, -inf  ;;  %v5426_v1 = vpop.f32.mrb[32].mxu0  ;;  %v5438_v0 = vpop.xlane.xlu0 %1748  ;;  %4537 = vpow2.f32 %v1938_v37  ;;  %v1942_v18 = vmul.f32 1.442695, %v1874_v45  ;;  %v1876_v31 = vsub.f32 %v5211_v33, %v5414_v61 }
 0x315   : > { %1811 = vmax.xlane.f32.xlu1 %v1810_v49  ;;  %v5428_v3 = vpop.f32.mrb[33].mxu0  ;;  %v1861_v55 = vsel %vm665_vm1, %v5426_v1, -inf  ;;  %v5440_v49 = vpop.xlane.xlu1 %1745  ;;  %4539 = vpow2.f32 %v1972_v13  ;;  %v1948_v30 = vmul.f32 1.442695, %v1877_v28  ;;  %v1893_v14 = vsub.f32 %v5215_v34, %v5438_v0 }
 0x316   : > { %v1858_v23 = vsel %vm665_vm1, %v5428_v3, -inf  ;;  %4541 = vpow2.f32 %v1970_v39  ;;  %v1946_v33 = vmul.f32 1.442695, %v1876_v31  ;;  %v1892_v61 = vsub.f32 %v5217_v35, %v5440_v49 }
 0x317   : > { %4543 = vpow2.f32 %v1944_v32  ;;  %v1980_v34 = vmul.f32 1.442695, %v1893_v14 }
 0x318   : > { %1862 = vmax.xlane.f32.xlu0 %v1861_v55  ;;  %v5456_v47 = vpop.xlane.xlu0 %1706  ;;  %4545 = vpow2.f32 %v1942_v18 }
 0x319   : > { %1859 = vmax.xlane.f32.xlu1 %v1858_v23  ;;  %v5464_v4 = vpop.xlane.xlu1 %1703  ;;  %4547 = vpow2.f32 %v1976_v19  ;;  %v1879_v0 = vsub.f32 %v5223_v38, %v5456_v47  ;;  %v1978_v19 = vmul.f32 1.442695, %v1892_v61 }
 0x31a   : > { %v5444_v8 = vpop.f32.mrb[38].mxu1  ;;  %4549 = vpow2.f32 %v1974_v29  ;;  %v1878_v35 = vsub.f32 %v5227_v40, %v5464_v4 }
 0x31b   : > { %v5448_v10 = vpop.f32.mrb[39].mxu1  ;;  %v1819_v17 = vsel %vm665_vm1, %v5444_v8, -inf  ;;  %4551 = vpow2.f32 %v1948_v30  ;;  %v1952_v38 = vmul.f32 1.442695, %v1879_v0 }
 0x31c   : > { %1820 = vmax.xlane.f32.xlu0 %v1819_v17  ;;  %v1816_v63 = vsel %vm665_vm1, %v5448_v10, -inf  ;;  %v5454_v55 = vpop.f32.mrb[34].mxu0  ;;  %v5470_v17 = vpop.eup %4527  ;;  %4553 = vpow2.f32 %v1946_v33  ;;  %v1950_v40 = vmul.f32 1.442695, %v1878_v35 }
 0x31d   : > { %1817 = vmax.xlane.f32.xlu1 %v1816_v63  ;;  %v5458_v12 = vpop.f32.mrb[35].mxu0  ;;  %v1867_v11 = vsel %vm665_vm1, %v5454_v55, -inf  ;;  %v5472_v63 = vpop.eup %4529  ;;  %v2065_v21 = vsel %vm665_vm1, %v5470_v17, 0.0  ;;  %4555 = vpow2.f32 %v1980_v34 }
 0x31e   : > { %v1864_v23 = vsel %vm665_vm1, %v5458_v12, -inf  ;;  %v1755_v37 = vpop.xlane.xlu0 %1754  ;;  %v5480_v60 = vpop.eup %4531  ;;  %4557 = vpow2.f32 %v1978_v19 }
 0x31f   : > { %v5482_v20 = vpop.xlane.xlu1 %1751  ;;  %v5486_v13 = vpop.eup %4533  ;;  %v2113_v5 = vsel %vm665_vm1, %v5480_v60, 0.0  ;;  %v1895_v47 = vsub.f32 %v5231_v42, %v1755_v37  ;;  %4559 = vpow2.f32 %v1952_v38 }
 0x320   : > { %1868 = vmax.xlane.f32.xlu0 %v1867_v11  ;;  %v2062_v11 = vsel %vm665_vm1, %v5472_v63, 0.0  ;;  %v2110_v39 = vsel %vm665_vm1, %v5486_v13, 0.0  ;;  %v1894_v4 = vsub.f32 %v5233_v43, %v5482_v20  ;;  %4561 = vpow2.f32 %v1950_v40 }
 0x321   : > { %1865 = vmax.xlane.f32.xlu1 %v1864_v23  ;;  %v5494_v23 = vpop.eup %4535  ;;  %v1984_v42 = vmul.f32 1.442695, %v1895_v47 }
 0x322   : > { %v5498_v45 = vpop.eup %4537  ;;  %v1713_v32 = vpop.xlane.xlu0 %1712  ;;  %v2071_v18 = vsel %vm665_vm1, %v5494_v23, 0.0  ;;  %v1982_v43 = vmul.f32 1.442695, %v1894_v4 }
 0x323   : > { %v1710_v22 = vpop.xlane.xlu1 %1709  ;;  %v5506_v24 = vpop.eup %4539  ;;  %v1881_v37 = vsub.f32 %v5239_v46, %v1713_v32  ;;  %4563 = vpow2.f32 %v1984_v42 }
 0x324   : > { %2066 = vadd.xlane.f32.xlu0 %v2065_v21  ;;  %v2068_v21 = vsel %vm665_vm1, %v5498_v45, 0.0  ;;  %v2119_v28 = vsel %vm665_vm1, %v5506_v24, 0.0  ;;  %v1880_v20 = vsub.f32 %v5243_v48, %v1710_v22  ;;  %4565 = vpow2.f32 %v1982_v43 }
 0x325   : > { %2063 = vadd.xlane.f32.xlu1 %v2062_v11  ;;  %v5510_v11 = vpop.eup %4541 }
 0x326   : > { %v1761_v49 = vpop.xlane.xlu0 %1760  ;;  %v5518_v29 = vpop.eup %4543  ;;  %v1954_v32 = vmul.f32 1.442695, %v1880_v20 }
 0x327   : > { %v1758_v31 = vpop.xlane.xlu1 %1757  ;;  %v2077_v30 = vsel %vm665_vm1, %v5518_v29, 0.0  ;;  %v1897_v46 = vsub.f32 %v5247_v50, %v1761_v49 }
 0x328   : > { %2114 = vadd.xlane.f32.xlu0 %v2113_v5  ;;  %v2116_v5 = vsel %vm665_vm1, %v5510_v11, 0.0  ;;  %v1896_v48 = vsub.f32 %v5249_v51, %v1758_v31 }
 0x329   : > { %2111 = vadd.xlane.f32.xlu1 %v2110_v39  ;;  %v5522_v39 = vpop.eup %4545  ;;  %v1988_v50 = vmul.f32 1.442695, %v1897_v46 }
 0x32a   : > { %v5529_v14 = vpop.eup %4547  ;;  %v2074_v33 = vsel %vm665_vm1, %v5522_v39, 0.0  ;;  %v1986_v51 = vmul.f32 1.442695, %v1896_v48 }
 0x32b   : > { %v5533_v61 = vpop.eup %4549  ;;  %v2125_v34 = vsel %vm665_vm1, %v5529_v14, 0.0 }
 0x32c   : > { %2072 = vadd.xlane.f32.xlu0 %v2071_v18  ;;  %v1719_v18 = vpop.xlane.xlu0 %1718  ;;  %v5539_v0 = vpop.eup %4551  ;;  %v2122_v19 = vsel %vm665_vm1, %v5533_v61, 0.0 }
 0x32d   : > { %2069 = vadd.xlane.f32.xlu1 %v2068_v21  ;;  %v1716_v21 = vpop.xlane.xlu1 %1715  ;;  %v5543_v35 = vpop.eup %4553  ;;  %v1883_v49 = vsub.f32 %v5255_v54, %v1719_v18 }
 0x32e   : > { %v5549_v38 = vpop.eup %4555  ;;  %v2080_v40 = vsel %vm665_vm1, %v5543_v35, 0.0  ;;  %v1882_v31 = vsub.f32 %v5259_v56, %v1716_v21 }
 0x32f   : > { %v5553_v4 = vpop.eup %4557  ;;  %v1960_v20 = vmul.f32 1.442695, %v1883_v49 }
 0x330   : > { %2120 = vadd.xlane.f32.xlu0 %v2119_v28  ;;  %v1956_v28 = vmul.f32 1.442695, %v1881_v37  ;;  %v1767_v22 = vpop.xlane.xlu0 %1766  ;;  %v2128_v42 = vsel %vm665_vm1, %v5553_v4, 0.0  ;;  %v1958_v56 = vmul.f32 1.442695, %v1882_v31 }
 0x331   : > { %2117 = vadd.xlane.f32.xlu1 %v2116_v5  ;;  %v2083_v5 = vsel %vm665_vm1, %v5539_v0, 0.0  ;;  %v1764_v47 = vpop.xlane.xlu1 %1763  ;;  %v1899_v18 = vsub.f32 %v5263_v58, %v1767_v22 }
 0x332   : > { %4567 = vpow2.f32 %v1956_v28  ;;  %v1898_v21 = vsub.f32 %v5265_v59, %v1764_v47 }
 0x333   : > { %4569 = vpow2.f32 %v1954_v32  ;;  %v1992_v32 = vmul.f32 1.442695, %v1899_v18 }
 0x334   : > { %2078 = vadd.xlane.f32.xlu0 %v2077_v30  ;;  %v2131_v30 = vsel %vm665_vm1, %v5549_v38, 0.0  ;;  %v1725_v43 = vpop.xlane.xlu0 %1724  ;;  %4571 = vpow2.f32 %v1988_v50  ;;  %v1990_v48 = vmul.f32 1.442695, %v1898_v21 }
 0x335   : > { %2075 = vadd.xlane.f32.xlu1 %v2074_v33  ;;  %v5559_v33 = vpop.eup %4559  ;;  %v1722_v54 = vpop.xlane.xlu1 %1721  ;;  %4573 = vpow2.f32 %v1986_v51  ;;  %v1885_v58 = vsub.f32 %v5271_v62, %v1725_v43  ;;  %v6179_v51 = vmov 0.0|0.0  }
 0x336   : > { %v5563_v37 = vpop.eup %4561  ;;  %4575 = vpow2.f32 %v1960_v20  ;;  %v1884_v59 = vsub.f32 %v5275_v2, %v1722_v54  ;;  %4304 = vmatprep.subr.bf16.mxu1 %v6179_v51  ;;  %4336 = vmatprep.subr.bf16.mxu0 %v6179_v51 }
 0x337   : > { %v2086_v28 = vsel %vm665_vm1, %v5563_v37, 0.0  ;;  %4577 = vpow2.f32 %v1958_v56  ;;  %v1964_v62 = vmul.f32 1.442695, %v1885_v58 }
 0x338   : > { %2126 = vadd.xlane.f32.xlu0 %v2125_v34  ;;  %v2089_v34 = vsel %vm665_vm1, %v5559_v33, 0.0  ;;  %v1773_v22 = vpop.xlane.xlu0 %1772  ;;  %4579 = vpow2.f32 %v1992_v32  ;;  %v1962_v31 = vmul.f32 1.442695, %v1884_v59 }
 0x339   : > { %2123 = vadd.xlane.f32.xlu1 %v2122_v19  ;;  %v5569_v19 = vpop.eup %4563  ;;  %v1901_v2 = vsub.f32 %v5279_v6, %v1773_v22  ;;  %4581 = vpow2.f32 %v1990_v48 }
 0x33a   : > { %v5573_v46 = vpop.eup %4565  ;;  %4583 = vpow2.f32 %v1964_v62 }
 0x33b   : > { %v2134_v50 = vsel %vm665_vm1, %v5573_v46, 0.0  ;;  %v1996_v6 = vmul.f32 1.442695, %v1901_v2  ;;  %4585 = vpow2.f32 %v1962_v31 }
 0x33c   : > { %2084 = vadd.xlane.f32.xlu0 %v2083_v5  ;;  %v2137_v5 = vsel %vm665_vm1, %v5569_v19, 0.0  ;;  %v5579_v47 = vpop.eup %4567 }
 0x33d   : > { %2081 = vadd.xlane.f32.xlu1 %v2080_v40  ;;  %v1770_v40 = vpop.xlane.xlu1 %1769  ;;  %v5583_v49 = vpop.eup %4569  ;;  %4587 = vpow2.f32 %v1996_v6 }
 0x33e   : > { %v5591_v43 = vpop.eup %4571  ;;  %v2092_v20 = vsel %vm665_vm1, %v5583_v49, 0.0 }
 0x33f   : > { %v5595_v54 = vpop.eup %4573  ;;  %v2143_v56 = vsel %vm665_vm1, %v5591_v43, 0.0 }
 0x340   : > { %2132 = vadd.xlane.f32.xlu0 %v2131_v30  ;;  %v1900_v30 = vsub.f32 %v5281_v7, %v1770_v40  ;;  %v5599_v7 = vpop.eup %4575  ;;  %v2140_v21 = vsel %vm665_vm1, %v5595_v54, 0.0 }
 0x341   : > { %2129 = vadd.xlane.f32.xlu1 %v2128_v42  ;;  %v2095_v42 = vsel %vm665_vm1, %v5579_v47, 0.0 }
 0x342   : > { %v1994_v18 = vmul.f32 1.442695, %v1900_v30 }
 0x344   : > { %2090 = vadd.xlane.f32.xlu0 %v2089_v34  ;;  %v5603_v34 = vpop.eup %4577  ;;  %4589 = vpow2.f32 %v1994_v18 }
 0x345   : > { %2087 = vadd.xlane.f32.xlu1 %v2086_v28  ;;  %v2101_v28 = vsel %vm665_vm1, %v5599_v7, 0.0  ;;  %v5607_v32 = vpop.eup %4579  ;;  %v2098_v58 = vsel %vm665_vm1, %v5603_v34, 0.0 }
 0x346   : > { %v5611_v48 = vpop.eup %4581  ;;  %v2149_v59 = vsel %vm665_vm1, %v5607_v32, 0.0 }
 0x347   : > { %v5615_v22 = vpop.eup %4583 }
 0x348   : > { %2138 = vadd.xlane.f32.xlu0 %v2137_v5  ;;  %v2146_v5 = vsel %vm665_vm1, %v5611_v48, 0.0  ;;  %v5619_v40 = vpop.eup %4585 }
 0x349   : > { %2135 = vadd.xlane.f32.xlu1 %v2134_v50  ;;  %v2107_v50 = vsel %vm665_vm1, %v5615_v22, 0.0  ;;  %v5623_v62 = vpop.eup %4587  ;;  %v2104_v2 = vsel %vm665_vm1, %v5619_v40, 0.0 }
 0x34a   : > { %v2155_v30 = vsel %vm665_vm1, %v5623_v62, 0.0 }
 0x34c   : > { %2096 = vadd.xlane.f32.xlu0 %v2095_v42 }
 0x34d   : > { %2093 = vadd.xlane.f32.xlu1 %v2092_v20 }
 0x34e   : > { %v5627_v31 = vpop.eup %4589 }
 0x34f   : > { %v2152_v42 = vsel %vm665_vm1, %v5627_v31, 0.0 }
 0x350   : > { %2144 = vadd.xlane.f32.xlu0 %v2143_v56 }
 0x351   : > { %2141 = vadd.xlane.f32.xlu1 %v2140_v21 }
 0x354   : > { %2102 = vadd.xlane.f32.xlu0 %v2101_v28 }
 0x355   : > { %2099 = vadd.xlane.f32.xlu1 %v2098_v58 }
 0x358   : > { %2150 = vadd.xlane.f32.xlu0 %v2149_v59 }
 0x359   : > { %2147 = vadd.xlane.f32.xlu1 %v2146_v5 }
 0x35c   : > { %2108 = vadd.xlane.f32.xlu0 %v2107_v50 }
 0x35d   : > { %2105 = vadd.xlane.f32.xlu1 %v2104_v2 }
 0x360   : > { %2156 = vadd.xlane.f32.xlu0 %v2155_v30 }
 0x361   : > { %2153 = vadd.xlane.f32.xlu1 %v2152_v42 }
 0x371   : > { %v1779_v20 = vpop.xlane.xlu0 %1778 }
 0x372   : > { %v1903_v6 = vsub.f32 %v5289_v15, %v1779_v20  ;;  %v1776_v18 = vpop.xlane.xlu1 %1775 }
 0x373   : > { %v1902_v56 = vsub.f32 %v5291_v16, %v1776_v18 }
 0x374   : > { %v2000_v21 = vmul.f32 1.442695, %v1903_v6 }
 0x375   : > { %v1998_v28 = vmul.f32 1.442695, %v1902_v56  ;;  %v1827_v58 = vpop.xlane.xlu0 %1826 }
 0x376   : > { %4591 = vpow2.f32 %v2000_v21  ;;  %v1919_v59 = vsub.f32 %v5297_v27, %v1827_v58  ;;  %v1824_v5 = vpop.xlane.xlu1 %1823 }
 0x377   : > { %4593 = vpow2.f32 %v1998_v28  ;;  %v1918_v50 = vsub.f32 %v5299_v26, %v1824_v5 }
 0x378   : > { %v2032_v2 = vmul.f32 1.442695, %v1919_v59 }
 0x379   : > { %v2030_v30 = vmul.f32 1.442695, %v1918_v50  ;;  %v1785_v51 = vpop.xlane.xlu0 %1784 }
 0x37a   : > { %4595 = vpow2.f32 %v2032_v2  ;;  %v1905_v42 = vsub.f32 %v5305_v25, %v1785_v51  ;;  %v1782_v15 = vpop.xlane.xlu1 %1781 }
 0x37b   : > { %4597 = vpow2.f32 %v2030_v30  ;;  %v1904_v16 = vsub.f32 %v5307_v36, %v1782_v15 }
 0x37c   : > { %v2004_v20 = vmul.f32 1.442695, %v1905_v42 }
 0x37d   : > { %v2002_v6 = vmul.f32 1.442695, %v1904_v16  ;;  %v1833_v18 = vpop.xlane.xlu0 %1832 }
 0x37e   : > { %4599 = vpow2.f32 %v2004_v20  ;;  %v1921_v27 = vsub.f32 %v5313_v41, %v1833_v18  ;;  %v1830_v56 = vpop.xlane.xlu1 %1829 }
 0x37f   : > { %4601 = vpow2.f32 %v2002_v6  ;;  %v1920_v26 = vsub.f32 %v5315_v44, %v1830_v56  ;;  %v6238_v44 = vld [vmem:[#allocation16_spill] sm:$0xff]  ;;  %v6181_v56 = vmov 0.0  }
 0x380   : > { %v5641_v21 = vpop.eup %4591  ;;  %v2036_v28 = vmul.f32 1.442695, %v1921_v27  ;;  %4152 = vmatprep.mubr.msk.f32.mxu1 %vm4869_vm3, %v6181_v56  ;;  %4187 = vmatprep.mubr.msk.f32.mxu0 %vm4869_vm3, %v6181_v56 }
 0x381   : > { %v5643_v58 = vpop.eup %4593  ;;  %v2034_v25 = vmul.f32 1.442695, %v1920_v26  ;;  %v1791_v51 = vpop.xlane.xlu0 %1790  ;;  %v2161_v36 = vsel %vm665_vm1, %v5641_v21, 0.0  ;;  %v6241_v26 = vld [vmem:[#allocation18_spill] sm:$0xff] }
 0x382   : > { %4603 = vpow2.f32 %v2036_v28  ;;  %v1907_v59 = vsub.f32 %v5323_v52, %v1791_v51  ;;  %v1788_v5 = vpop.xlane.xlu1 %1787  ;;  %2162 = vadd.xlane.f32.xlu0 %v2161_v36  ;;  %v2158_v41 = vsel %vm665_vm1, %v5643_v58, 0.0  ;;  %v6240_v52 = vld [vmem:[#allocation17_spill] sm:$0xff] }
 0x383   : > { %4605 = vpow2.f32 %v2034_v25  ;;  %v1906_v50 = vsub.f32 %v6238_v44, %v1788_v5  ;;  %2159 = vadd.xlane.f32.xlu1 %v2158_v41  ;;  %v6244_v44 = vld [vmem:[#allocation19_spill] sm:$0xff] }
 0x384   : > { %v5651_v2 = vpop.eup %4595  ;;  %v2008_v30 = vmul.f32 1.442695, %v1907_v59 }
 0x385   : > { %v5653_v42 = vpop.eup %4597  ;;  %v2006_v15 = vmul.f32 1.442695, %v1906_v50  ;;  %v1839_v16 = vpop.xlane.xlu0 %1838  ;;  %v2209_v20 = vsel %vm665_vm1, %v5651_v2, 0.0 }
 0x386   : > { %6239 = vst [vmem:[#allocation16_spill] sm:$0xff] %v5653_v42  ;;  %4607 = vpow2.f32 %v2008_v30  ;;  %v1923_v6 = vsub.f32 %v6240_v52, %v1839_v16  ;;  %v1836_v18 = vpop.xlane.xlu1 %1835  ;;  %2210 = vadd.xlane.f32.xlu0 %v2209_v20  ;;  %v2206_v27 = vsel %vm665_vm1, %v5653_v42, 0.0  ;;  %v6245_v16 = vld [vmem:[#allocation20_spill] sm:$0xff] }
 0x387   : > { %4609 = vpow2.f32 %v2006_v15  ;;  %v1922_v28 = vsub.f32 %v6241_v26, %v1836_v18  ;;  %2207 = vadd.xlane.f32.xlu1 %v2206_v27 }
 0x388   : > { %v5665_v25 = vpop.eup %4599  ;;  %v2040_v51 = vmul.f32 1.442695, %v1923_v6 }
 0x389   : > { %6242 = vst [vmem:[#allocation17_spill] sm:$0xff] %v5665_v25  ;;  %v5667_v36 = vpop.eup %4601  ;;  %v2038_v59 = vmul.f32 1.442695, %v1922_v28  ;;  %v1797_v5 = vpop.xlane.xlu0 %1796  ;;  %v2167_v41 = vsel %vm665_vm1, %v5665_v25, 0.0 }
 0x38a   : > { %6243 = vst [vmem:[#allocation18_spill] sm:$0xff] %v5667_v36  ;;  %4611 = vpow2.f32 %v2040_v51  ;;  %v1909_v50 = vsub.f32 %v6244_v44, %v1797_v5  ;;  %v1794_v30 = vpop.xlane.xlu1 %1793  ;;  %2168 = vadd.xlane.f32.xlu0 %v2167_v41  ;;  %v2164_v15 = vsel %vm665_vm1, %v5667_v36, 0.0  ;;  %v6248_v51 = vld [vmem:[#allocation21_spill] sm:$0xff]  ;;  %v6249_v44 = vld [vmem:[#allocation22_spill] sm:$0xff] }
 0x38b   : > { %4613 = vpow2.f32 %v2038_v59  ;;  %v1908_v20 = vsub.f32 %v6245_v16, %v1794_v30  ;;  %2165 = vadd.xlane.f32.xlu1 %v2164_v15 }
 0x38c   : > { %v5675_v52 = vpop.eup %4603  ;;  %v2012_v6 = vmul.f32 1.442695, %v1909_v50 }
 0x38d   : > { %6246 = vst [vmem:[#allocation19_spill] sm:$0xff] %v5675_v52  ;;  %v5677_v18 = vpop.eup %4605  ;;  %v2010_v27 = vmul.f32 1.442695, %v1908_v20  ;;  %v1845_v26 = vpop.xlane.xlu0 %1844  ;;  %v2215_v28 = vsel %vm665_vm1, %v5675_v52, 0.0 }
 0x38e   : > { %6247 = vst [vmem:[#allocation20_spill] sm:$0xff] %v5677_v18  ;;  %4615 = vpow2.f32 %v2012_v6  ;;  %v1925_v5 = vsub.f32 %v6248_v51, %v1845_v26  ;;  %v1842_v41 = vpop.xlane.xlu1 %1841  ;;  %2216 = vadd.xlane.f32.xlu0 %v2215_v28  ;;  %v2212_v59 = vsel %vm665_vm1, %v5677_v18, 0.0  ;;  %v6252_v26 = vld [vmem:[#allocation23_spill] sm:$0xff] }
 0x38f   : > { %4617 = vpow2.f32 %v2010_v27  ;;  %v1924_v30 = vsub.f32 %v6249_v44, %v1842_v41  ;;  %2213 = vadd.xlane.f32.xlu1 %v2212_v59  ;;  %v6253_v41 = vld [vmem:[#allocation24_spill] sm:$0xff] }
 0x390   : > { %v5685_v50 = vpop.eup %4607  ;;  %v2044_v15 = vmul.f32 1.442695, %v1925_v5 }
 0x391   : > { %6250 = vst [vmem:[#allocation21_spill] sm:$0xff] %v5685_v50  ;;  %v5687_v16 = vpop.eup %4609  ;;  %v2042_v20 = vmul.f32 1.442695, %v1924_v30  ;;  %v1803_v56 = vpop.xlane.xlu0 %1802  ;;  %v2173_v6 = vsel %vm665_vm1, %v5685_v50, 0.0 }
 0x392   : > { %6251 = vst [vmem:[#allocation22_spill] sm:$0xff] %v5687_v16  ;;  %4619 = vpow2.f32 %v2044_v15  ;;  %v1911_v28 = vsub.f32 %v6252_v26, %v1803_v56  ;;  %v1800_v51 = vpop.xlane.xlu1 %1799  ;;  %2174 = vadd.xlane.f32.xlu0 %v2173_v6  ;;  %v2170_v27 = vsel %vm665_vm1, %v5687_v16, 0.0  ;;  %v6256_v56 = vld [vmem:[#allocation25_spill] sm:$0xff] }
 0x393   : > { %4621 = vpow2.f32 %v2042_v20  ;;  %v1910_v59 = vsub.f32 %v6253_v41, %v1800_v51  ;;  %2171 = vadd.xlane.f32.xlu1 %v2170_v27  ;;  %v6257_v51 = vld [vmem:[#allocation26_spill] sm:$0xff] }
 0x394   : > { %v5695_v5 = vpop.eup %4611  ;;  %v2016_v44 = vmul.f32 1.442695, %v1911_v28 }
 0x395   : > { %6254 = vst [vmem:[#allocation23_spill] sm:$0xff] %v5695_v5  ;;  %v5697_v30 = vpop.eup %4613  ;;  %v2014_v18 = vmul.f32 1.442695, %v1910_v59  ;;  %v1851_v52 = vpop.xlane.xlu0 %1850  ;;  %v2221_v15 = vsel %vm665_vm1, %v5695_v5, 0.0 }
 0x396   : > { %6255 = vst [vmem:[#allocation24_spill] sm:$0xff] %v5697_v30  ;;  %4623 = vpow2.f32 %v2016_v44  ;;  %v1927_v6 = vsub.f32 %v6256_v56, %v1851_v52  ;;  %v1848_v26 = vpop.xlane.xlu1 %1847  ;;  %2222 = vadd.xlane.f32.xlu0 %v2221_v15  ;;  %v2218_v20 = vsel %vm665_vm1, %v5697_v30, 0.0  ;;  %v6260_v52 = vld [vmem:[#allocation27_spill] sm:$0xff] }
 0x397   : > { %4625 = vpow2.f32 %v2014_v18  ;;  %v1926_v27 = vsub.f32 %v6257_v51, %v1848_v26  ;;  %2219 = vadd.xlane.f32.xlu1 %v2218_v20  ;;  %v6261_v26 = vld [vmem:[#allocation28_spill] sm:$0xff] }
 0x398   : > { %v5705_v28 = vpop.eup %4615  ;;  %v2048_v41 = vmul.f32 1.442695, %v1927_v6 }
 0x399   : > { %6258 = vst [vmem:[#allocation25_spill] sm:$0xff] %v5705_v28  ;;  %v5707_v59 = vpop.eup %4617  ;;  %v2046_v16 = vmul.f32 1.442695, %v1926_v27  ;;  %v1809_v50 = vpop.xlane.xlu0 %1808  ;;  %v2179_v44 = vsel %vm665_vm1, %v5705_v28, 0.0 }
 0x39a   : > { %6259 = vst [vmem:[#allocation26_spill] sm:$0xff] %v5707_v59  ;;  %4627 = vpow2.f32 %v2048_v41  ;;  %v1913_v15 = vsub.f32 %v6260_v52, %v1809_v50  ;;  %v1806_v56 = vpop.xlane.xlu1 %1805  ;;  %2180 = vadd.xlane.f32.xlu0 %v2179_v44  ;;  %v2176_v18 = vsel %vm665_vm1, %v5707_v59, 0.0  ;;  %v6264_v50 = vld [vmem:[#allocation29_spill] sm:$0xff] }
 0x39b   : > { %4629 = vpow2.f32 %v2046_v16  ;;  %v1912_v20 = vsub.f32 %v6261_v26, %v1806_v56  ;;  %2177 = vadd.xlane.f32.xlu1 %v2176_v18 }
 0x39c   : > { %v5715_v6 = vpop.eup %4619  ;;  %v2020_v51 = vmul.f32 1.442695, %v1913_v15 }
 0x39d   : > { %6262 = vst [vmem:[#allocation27_spill] sm:$0xff] %v5715_v6  ;;  %v5717_v27 = vpop.eup %4621  ;;  %v2018_v30 = vmul.f32 1.442695, %v1912_v20  ;;  %v1857_v5 = vpop.xlane.xlu0 %1856  ;;  %v2227_v41 = vsel %vm665_vm1, %v5715_v6, 0.0 }
 0x39e   : > { %6263 = vst [vmem:[#allocation28_spill] sm:$0xff] %v5717_v27  ;;  %4631 = vpow2.f32 %v2020_v51  ;;  %v1929_v44 = vsub.f32 %v6264_v50, %v1857_v5  ;;  %v1854_v52 = vpop.xlane.xlu1 %1853  ;;  %2228 = vadd.xlane.f32.xlu0 %v2227_v41  ;;  %v2224_v16 = vsel %vm665_vm1, %v5717_v27, 0.0 }
 0x39f   : > { %4633 = vpow2.f32 %v2018_v30  ;;  %v1928_v56 = vsub.f32 %v5401_v57, %v1854_v52  ;;  %2225 = vadd.xlane.f32.xlu1 %v2224_v16 }
 0x3a0   : > { %v5725_v15 = vpop.eup %4623  ;;  %v2052_v18 = vmul.f32 1.442695, %v1929_v44 }
 0x3a1   : > { %6265 = vst [vmem:[#allocation29_spill] sm:$0xff] %v5725_v15  ;;  %v5727_v26 = vpop.eup %4625  ;;  %v2050_v20 = vmul.f32 1.442695, %v1928_v56  ;;  %v1815_v59 = vpop.xlane.xlu0 %1814  ;;  %v2185_v51 = vsel %vm665_vm1, %v5725_v15, 0.0 }
 0x3a2   : > { %6266 = vst [vmem:[#allocation30_spill] sm:$0xff] %v5727_v26  ;;  %4635 = vpow2.f32 %v2052_v18  ;;  %v1915_v5 = vsub.f32 %v5416_v53, %v1815_v59  ;;  %v1812_v41 = vpop.xlane.xlu1 %1811  ;;  %2186 = vadd.xlane.f32.xlu0 %v2185_v51  ;;  %v2182_v30 = vsel %vm665_vm1, %v5727_v26, 0.0 }
 0x3a3   : > { %4637 = vpow2.f32 %v2050_v20  ;;  %v1914_v57 = vsub.f32 %v5420_v9, %v1812_v41  ;;  %2183 = vadd.xlane.f32.xlu1 %v2182_v30 }
 0x3a4   : > { %v5735_v50 = vpop.eup %4627  ;;  %v2024_v44 = vmul.f32 1.442695, %v1915_v5 }
 0x3a5   : > { %6267 = vst [vmem:[#allocation31_spill] sm:$0xff] %v5735_v50  ;;  %v5737_v52 = vpop.eup %4629  ;;  %v2022_v16 = vmul.f32 1.442695, %v1914_v57  ;;  %v1863_v56 = vpop.xlane.xlu0 %1862  ;;  %v2233_v18 = vsel %vm665_vm1, %v5735_v50, 0.0 }
 0x3a6   : > { %6268 = vst [vmem:[#allocation32_spill] sm:$0xff] %v5737_v52  ;;  %4639 = vpow2.f32 %v2024_v44  ;;  %v1931_v53 = vsub.f32 %v5426_v1, %v1863_v56  ;;  %v1860_v59 = vpop.xlane.xlu1 %1859  ;;  %2234 = vadd.xlane.f32.xlu0 %v2233_v18  ;;  %v2230_v20 = vsel %vm665_vm1, %v5737_v52, 0.0 }
 0x3a7   : > { %4641 = vpow2.f32 %v2022_v16  ;;  %v1930_v9 = vsub.f32 %v5428_v3, %v1860_v59  ;;  %2231 = vadd.xlane.f32.xlu1 %v2230_v20 }
 0x3a8   : > { %v5745_v51 = vpop.eup %4631  ;;  %v2056_v5 = vmul.f32 1.442695, %v1931_v53 }
 0x3a9   : > { %6269 = vst [vmem:[#allocation33_spill] sm:$0xff] %v5745_v51  ;;  %v5747_v41 = vpop.eup %4633  ;;  %v2054_v30 = vmul.f32 1.442695, %v1930_v9  ;;  %v1821_v57 = vpop.xlane.xlu0 %1820  ;;  %v2191_v44 = vsel %vm665_vm1, %v5745_v51, 0.0 }
 0x3aa   : > { %6270 = vst [vmem:[#allocation34_spill] sm:$0xff] %v5747_v41  ;;  %4643 = vpow2.f32 %v2056_v5  ;;  %v1917_v1 = vsub.f32 %v5444_v8, %v1821_v57  ;;  %v1818_v56 = vpop.xlane.xlu1 %1817  ;;  %2192 = vadd.xlane.f32.xlu0 %v2191_v44  ;;  %v2188_v16 = vsel %vm665_vm1, %v5747_v41, 0.0 }
 0x3ab   : > { %4645 = vpow2.f32 %v2054_v30  ;;  %v1916_v3 = vsub.f32 %v5448_v10, %v1818_v56  ;;  %2189 = vadd.xlane.f32.xlu1 %v2188_v16 }
 0x3ac   : > { %v5755_v18 = vpop.eup %4635  ;;  %v2028_v53 = vmul.f32 1.442695, %v1917_v1 }
 0x3ad   : > { %6271 = vst [vmem:[#allocation35_spill] sm:$0xff] %v5755_v18  ;;  %v5757_v59 = vpop.eup %4637  ;;  %v2026_v20 = vmul.f32 1.442695, %v1916_v3  ;;  %v1869_v9 = vpop.xlane.xlu0 %1868  ;;  %v2239_v5 = vsel %vm665_vm1, %v5755_v18, 0.0 }
 0x3ae   : > { %6272 = vst [vmem:[#allocation36_spill] sm:$0xff] %v5757_v59  ;;  %4647 = vpow2.f32 %v2028_v53  ;;  %v1933_v8 = vsub.f32 %v5454_v55, %v1869_v9  ;;  %v1866_v57 = vpop.xlane.xlu1 %1865  ;;  %2240 = vadd.xlane.f32.xlu0 %v2239_v5  ;;  %v2236_v30 = vsel %vm665_vm1, %v5757_v59, 0.0 }
 0x3af   : > { %4649 = vpow2.f32 %v2026_v20  ;;  %v1932_v10 = vsub.f32 %v5458_v12, %v1866_v57  ;;  %2237 = vadd.xlane.f32.xlu1 %v2236_v30 }
 0x3b0   : > { %v5765_v44 = vpop.eup %4639  ;;  %v2060_v1 = vmul.f32 1.442695, %v1933_v8 }
 0x3b1   : > { %6273 = vst [vmem:[#allocation37_spill] sm:$0xff] %v5765_v44  ;;  %v5767_v56 = vpop.eup %4641  ;;  %v2058_v16 = vmul.f32 1.442695, %v1932_v10  ;;  %v2067_v3 = vpop.xlane.xlu0 %2066  ;;  %v2197_v53 = vsel %vm665_vm1, %v5765_v44, 0.0 }
 0x3b2   : > { %6274 = vst [vmem:[#allocation38_spill] sm:$0xff] %v5767_v56  ;;  %4651 = vpow2.f32 %v2060_v1  ;;  %v2064_v55 = vpop.xlane.xlu1 %2063  ;;  %2198 = vadd.xlane.f32.xlu0 %v2197_v53  ;;  %v2194_v9 = vsel %vm665_vm1, %v5767_v56, 0.0 }
 0x3b3   : > { %4653 = vpow2.f32 %v2058_v16  ;;  %2195 = vadd.xlane.f32.xlu1 %v2194_v9 }
 0x3b4   : > { %v5773_v12 = vpop.eup %4643  ;;  %4655 = vrcp.f32 %v2067_v3 }
 0x3b5   : > { %6275 = vst [vmem:[#allocation39_spill] sm:$0xff] %v5773_v12  ;;  %v5775_v20 = vpop.eup %4645  ;;  %4657 = vrcp.f32 %v2064_v55  ;;  %v2115_v5 = vpop.xlane.xlu0 %2114  ;;  %v2245_v8 = vsel %vm665_vm1, %v5773_v12, 0.0 }
 0x3b6   : > { %6276 = vst [vmem:[#allocation40_spill] sm:$0xff] %v5775_v20  ;;  %4659 = vrcp.f32 %v2115_v5  ;;  %v2112_v57 = vpop.xlane.xlu1 %2111  ;;  %2246 = vadd.xlane.f32.xlu0 %v2245_v8  ;;  %v2242_v30 = vsel %vm665_vm1, %v5775_v20, 0.0 }
 0x3b7   : > { %4661 = vrcp.f32 %v2112_v57  ;;  %2243 = vadd.xlane.f32.xlu1 %v2242_v30 }
 0x3b8   : > { %v5781_v10 = vpop.eup %4647 }
 0x3b9   : > { %6277 = vst [vmem:[#allocation41_spill] sm:$0xff] %v5781_v10  ;;  %v5783_v1 = vpop.eup %4649  ;;  %v2073_v16 = vpop.xlane.xlu0 %2072  ;;  %v2203_v53 = vsel %vm665_vm1, %v5781_v10, 0.0 }
 0x3ba   : > { %6278 = vst [vmem:[#allocation42_spill] sm:$0xff] %v5783_v1  ;;  %4663 = vrcp.f32 %v2073_v16  ;;  %v2070_v9 = vpop.xlane.xlu1 %2069  ;;  %2204 = vadd.xlane.f32.xlu0 %v2203_v53  ;;  %v2200_v12 = vsel %vm665_vm1, %v5783_v1, 0.0 }
 0x3bb   : > { %4665 = vrcp.f32 %v2070_v9  ;;  %2201 = vadd.xlane.f32.xlu1 %v2200_v12 }
 0x3bc   : > { %v5789_v8 = vpop.eup %4651 }
 0x3bd   : > { %6279 = vst [vmem:[#allocation43_spill] sm:$0xff] %v5789_v8  ;;  %v5791_v20 = vpop.eup %4653  ;;  %v2121_v30 = vpop.xlane.xlu0 %2120  ;;  %v2251_v56 = vsel %vm665_vm1, %v5789_v8, 0.0 }
 0x3be   : > { %6280 = vst [vmem:[#allocation44_spill] sm:$0xff] %v5791_v20  ;;  %v4656_v44 = vpop.eup %4655  ;;  %4667 = vrcp.f32 %v2121_v30  ;;  %v2118_v59 = vpop.xlane.xlu1 %2117  ;;  %2252 = vadd.xlane.f32.xlu0 %v2251_v56  ;;  %v2248_v53 = vsel %vm665_vm1, %v5791_v20, 0.0 }
 0x3bf   : > { %v4658_v10 = vpop.eup %4657  ;;  %v2319_v18 = vmul.f32 %v4656_v44, %v2067_v3  ;;  %4669 = vrcp.f32 %v2118_v59  ;;  %2249 = vadd.xlane.f32.xlu1 %v2248_v53 }
 0x3c0   : > { %v4660_v12 = vpop.eup %4659  ;;  %v2318_v1 = vmul.f32 %v4658_v10, %v2064_v55 }
 0x3c1   : > { %v4662_v41 = vpop.eup %4661  ;;  %v2383_v51 = vsub.f32 2.0, %v2319_v18  ;;  %v2335_v52 = vmul.f32 %v4660_v12, %v2115_v5  ;;  %v2079_v50 = vpop.xlane.xlu0 %2078 }
 0x3c2   : > { %v2382_v26 = vsub.f32 2.0, %v2318_v1  ;;  %v2334_v15 = vmul.f32 %v4662_v41, %v2112_v57  ;;  %4671 = vrcp.f32 %v2079_v50  ;;  %v2076_v8 = vpop.xlane.xlu1 %2075 }
 0x3c3   : > { %v2447_v27 = vmul.f32 %v4656_v44, %v2383_v51  ;;  %v2399_v6 = vsub.f32 2.0, %v2335_v52  ;;  %4673 = vrcp.f32 %v2076_v8 }
 0x3c4   : > { %v4664_v56 = vpop.eup %4663  ;;  %v2446_v28 = vmul.f32 %v4658_v10, %v2382_v26  ;;  %v2398_v20 = vsub.f32 2.0, %v2334_v15 }
 0x3c5   : > { %v4666_v36 = vpop.eup %4665  ;;  %v2511_v3 = vmul.f32 %v5470_v17, %v2447_v27  ;;  %v2463_v53 = vmul.f32 %v4660_v12, %v2399_v6  ;;  %v2321_v25 = vmul.f32 %v4664_v56, %v2073_v16  ;;  %v2127_v55 = vpop.xlane.xlu0 %2126 }
 0x3c6   : > { %v2510_v18 = vmul.f32 %v5472_v63, %v2446_v28  ;;  %v2462_v5 = vmul.f32 %v4662_v41, %v2398_v20  ;;  %v2320_v42 = vmul.f32 %v4666_v36, %v2070_v9  ;;  %4675 = vrcp.f32 %v2127_v55  ;;  %v2124_v57 = vpop.xlane.xlu1 %2123 }
 0x3c7   : > { %v2527_v1 = vmul.f32 %v5480_v60, %v2463_v53  ;;  %v2385_v51 = vsub.f32 2.0, %v2321_v25  ;;  %4677 = vrcp.f32 %v2124_v57  ;;  %v6283_v9 = vmov 0.0|0.0  }
 0x3c8   : > { %v4668_v17 = vpop.eup %4667  ;;  %v4305_v6 = vpack.c.bf16 %v2511_v3, %v2510_v18  ;;  %v2526_v27 = vmul.f32 %v5486_v13, %v2462_v5  ;;  %v2384_v26 = vsub.f32 2.0, %v2320_v42  ;;  %v513_v3 = vld [vmem:[%s6147_s5 + $0x30] sm:$0xff] }
 0x3c9   : > { %v4670_v63 = vpop.eup %4669  ;;  %v2449_v28 = vmul.f32 %v4664_v56, %v2385_v51  ;;  %v2337_v52 = vmul.f32 %v4668_v17, %v2121_v30  ;;  %v2085_v41 = vpop.xlane.xlu0 %2084 }
 0x3ca   : > { %v4337_v44 = vpack.c.bf16 %v2527_v1, %v2526_v27  ;;  %v2448_v20 = vmul.f32 %v4666_v36, %v2384_v26  ;;  %v2336_v60 = vmul.f32 %v4670_v63, %v2118_v59  ;;  %4307 = vmatpush3.bf16.xpose.msk.msra.mxu1 %vm5802_vm4, %v4305_v6  ;;  %4679 = vrcp.f32 %v2085_v41  ;;  %v2082_v25 = vpop.xlane.xlu1 %2081 }
 0x3cb   : > { %v2513_v10 = vmul.f32 %v5494_v23, %v2449_v28  ;;  %v2401_v16 = vsub.f32 2.0, %v2337_v52  ;;  %4681 = vrcp.f32 %v2082_v25  ;;  %4308 = vmatprep.subr.bf16.mxu1 %v6283_v9 }
 0x3cc   : > { %v4672_v13 = vpop.eup %4671  ;;  %v2512_v42 = vmul.f32 %v5498_v45, %v2448_v20  ;;  %v2400_v12 = vsub.f32 2.0, %v2336_v60  ;;  %4339 = vmatpush3.bf16.xpose.msk.msra.mxu0 %vm5802_vm4, %v4337_v44 }
 0x3cd   : > { %v4674_v36 = vpop.eup %4673  ;;  %v2465_v59 = vmul.f32 %v4668_v17, %v2401_v16  ;;  %v2323_v30 = vmul.f32 %v4672_v13, %v2079_v50  ;;  %v2133_v56 = vpop.xlane.xlu0 %2132  ;;  %4340 = vmatprep.subr.bf16.mxu0 %v6283_v9 }
 0x3ce   : > { %v4309_v23 = vpack.c.bf16 %v2513_v10, %v2512_v42  ;;  %v2464_v53 = vmul.f32 %v4670_v63, %v2400_v12  ;;  %v2322_v18 = vmul.f32 %v4674_v36, %v2076_v8  ;;  %4683 = vrcp.f32 %v2133_v56  ;;  %v2130_v5 = vpop.xlane.xlu1 %2129  ;;  %v3064_v63 = vld [vmem:[%s6149_s7] sm:$0xff]  ;;  %v514_v8 = vld [vmem:[%s6147_s5 + $0x38] sm:$0xff] }
 0x3cf   : > { %v2529_v45 = vmul.f32 %v5506_v24, %v2465_v59  ;;  %v2387_v1 = vsub.f32 2.0, %v2323_v30  ;;  %4685 = vrcp.f32 %v2130_v5 }
 0x3d0   : > { %v4676_v51 = vpop.eup %4675  ;;  %v2528_v17 = vmul.f32 %v5510_v11, %v2464_v53  ;;  %v2386_v50 = vsub.f32 2.0, %v2322_v18  ;;  %547 = vperm.xlu1 %4506, %v513_v3  }
 0x3d1   : > { %v4678_v6 = vpop.eup %4677  ;;  %v2451_v27 = vmul.f32 %v4672_v13, %v2387_v1  ;;  %v2339_v26 = vmul.f32 %v4676_v51, %v2127_v55  ;;  %v2091_v28 = vpop.xlane.xlu0 %2090 }
 0x3d2   : > { %v4341_v24 = vpack.c.bf16 %v2529_v45, %v2528_v17  ;;  %v2450_v52 = vmul.f32 %v4674_v36, %v2386_v50  ;;  %v2338_v44 = vmul.f32 %v4678_v6, %v2124_v57  ;;  %4311 = vmatpush3.bf16.xpose.msk.msra.mxu1 %vm5802_vm4, %v4309_v23  ;;  %4687 = vrcp.f32 %v2091_v28  ;;  %v2088_v11 = vpop.xlane.xlu1 %2087  ;;  %v3066_v36 = vld [vmem:[%s6149_s7 + $0x10] sm:$0xff] }
 0x3d3   : > { %v2515_v20 = vmul.f32 %v5518_v29, %v2451_v27  ;;  %v2403_v55 = vsub.f32 2.0, %v2339_v26  ;;  %4689 = vrcp.f32 %v2088_v11  ;;  %4312 = vmatprep.subr.bf16.mxu1 %v6283_v9  ;;  %v3065_v29 = vld [vmem:[%s6149_s7 + $0x8] sm:$0xff] }
 0x3d4   : > { %v4680_v60 = vpop.eup %4679  ;;  %v2514_v10 = vmul.f32 %v5522_v39, %v2450_v52  ;;  %v2402_v16 = vsub.f32 2.0, %v2338_v44  ;;  %3070 = vperm.xlu1 %4506, %v3064_v63   ;;  %552 = vperm.xlu0 %4505, %v514_v8  }
 0x3d5   : > { %v4682_v13 = vpop.eup %4681  ;;  %v2467_v42 = vmul.f32 %v4676_v51, %v2403_v55  ;;  %v2325_v57 = vmul.f32 %v4680_v60, %v2085_v41  ;;  %4343 = vmatpush3.bf16.xpose.msk.msra.mxu0 %vm5802_vm4, %v4341_v24  ;;  %v2139_v12 = vpop.xlane.xlu0 %2138 }
 0x3d6   : > { %v4313_v59 = vpack.c.bf16 %v2515_v20, %v2514_v10  ;;  %v2466_v39 = vmul.f32 %v4678_v6, %v2402_v16  ;;  %v2324_v30 = vmul.f32 %v4682_v13, %v2082_v25  ;;  %4691 = vrcp.f32 %v2139_v12  ;;  %v2136_v3 = vpop.xlane.xlu1 %2135  ;;  %4344 = vmatprep.subr.bf16.mxu0 %v6283_v9  ;;  %v3067_v25 = vld [vmem:[%s6149_s7 + $0x18] sm:$0xff] }
 0x3d7   : > { %v2531_v41 = vmul.f32 %v5529_v14, %v2467_v42  ;;  %v2389_v23 = vsub.f32 2.0, %v2325_v57  ;;  %4693 = vrcp.f32 %v2136_v3  ;;  %v3365_v14 = vld [vmem:[%s6152_s10] sm:$0xff] }
 0x3d8   : > { %v4684_v53 = vpop.eup %4683  ;;  %v2530_v18 = vmul.f32 %v5533_v61, %v2466_v39  ;;  %v2388_v45 = vsub.f32 2.0, %v2324_v30  ;;  %3075 = vperm.xlu1 %4506, %v3065_v29   ;;  %3080 = vperm.xlu0 %4505, %v3066_v36  }
 0x3d9   : > { %v4686_v1 = vpop.eup %4685  ;;  %v2453_v51 = vmul.f32 %v4680_v60, %v2389_v23  ;;  %v2341_v17 = vmul.f32 %v4684_v53, %v2133_v56  ;;  %v2097_v50 = vpop.xlane.xlu0 %2096  ;;  %v3367_v60 = vld [vmem:[%s6152_s10 + $0x10] sm:$0xff] }
 0x3da   : > { %v4345_v6 = vpack.c.bf16 %v2531_v41, %v2530_v18  ;;  %v2452_v27 = vmul.f32 %v4682_v13, %v2388_v45  ;;  %v2340_v26 = vmul.f32 %v4686_v1, %v2130_v5  ;;  %4315 = vmatpush3.bf16.xpose.msk.msra.mxu1 %vm5802_vm4, %v4313_v59  ;;  %4695 = vrcp.f32 %v2097_v50  ;;  %v2094_v61 = vpop.xlane.xlu1 %2093 }
 0x3db   : > { %v2517_v63 = vmul.f32 %v5539_v0, %v2453_v51  ;;  %v2405_v56 = vsub.f32 2.0, %v2341_v17  ;;  %4697 = vrcp.f32 %v2094_v61  ;;  %4316 = vmatprep.subr.bf16.mxu1 %v6283_v9  ;;  %v3366_v0 = vld [vmem:[%s6152_s10 + $0x8] sm:$0xff] }
 0x3dc   : > { %v4688_v8 = vpop.eup %4687  ;;  %v2516_v24 = vmul.f32 %v5543_v35, %v2452_v27  ;;  %v2404_v52 = vsub.f32 2.0, %v2340_v26  ;;  %3085 = vperm.xlu1 %4506, %v3067_v25   ;;  %3375 = vperm.xlu0 %4505, %v3365_v14   ;;  %v3371_v27 = vld [vmem:[%s6152_s10 + $0x30] sm:$0xff] }
 0x3dd   : > { %v4690_v44 = vpop.eup %4689  ;;  %v2469_v20 = vmul.f32 %v4684_v53, %v2405_v56  ;;  %v2327_v5 = vmul.f32 %v4688_v8, %v2091_v28  ;;  %4347 = vmatpush3.bf16.xpose.msk.msra.mxu0 %vm5802_vm4, %v4345_v6  ;;  %v2145_v55 = vpop.xlane.xlu0 %2144 }
 0x3de   : > { %v4317_v10 = vpack.c.bf16 %v2517_v63, %v2516_v24  ;;  %v2468_v35 = vmul.f32 %v4686_v1, %v2404_v52  ;;  %v2326_v16 = vmul.f32 %v4690_v44, %v2088_v11  ;;  %4699 = vrcp.f32 %v2145_v55  ;;  %v2142_v13 = vpop.xlane.xlu1 %2141  ;;  %4348 = vmatprep.subr.bf16.mxu0 %v6283_v9  ;;  %v3368_v11 = vld [vmem:[%s6152_s10 + $0x18] sm:$0xff] }
 0x3df   : > { %v2533_v28 = vmul.f32 %v5549_v38, %v2469_v20  ;;  %v2391_v42 = vsub.f32 2.0, %v2327_v5  ;;  %4701 = vrcp.f32 %v2142_v13  ;;  %v3369_v38 = vld [vmem:[%s6152_s10 + $0x20] sm:$0xff] }
 0x3e0   : > { %v4692_v57 = vpop.eup %4691  ;;  %v2532_v29 = vmul.f32 %v5553_v4, %v2468_v35  ;;  %v2390_v36 = vsub.f32 2.0, %v2326_v16  ;;  %3380 = vperm.xlu1 %4506, %v3366_v0   ;;  %3385 = vperm.xlu0 %4505, %v3367_v60  }
 0x3e1   : > { %v4694_v59 = vpop.eup %4693  ;;  %v2455_v39 = vmul.f32 %v4688_v8, %v2391_v42  ;;  %v2343_v30 = vmul.f32 %v4692_v57, %v2139_v12  ;;  %v2103_v41 = vpop.xlane.xlu0 %2102 }
 0x3e2   : > { %v4349_v23 = vpack.c.bf16 %v2533_v28, %v2532_v29  ;;  %v2454_v53 = vmul.f32 %v4690_v44, %v2390_v36  ;;  %v2342_v18 = vmul.f32 %v4694_v59, %v2136_v3  ;;  %4319 = vmatpush3.bf16.xpose.msk.msra.mxu1 %vm5802_vm4, %v4317_v10  ;;  %4703 = vrcp.f32 %v2103_v41  ;;  %v2100_v4 = vpop.xlane.xlu1 %2099 }
 0x3e3   : > { %v2519_v45 = vmul.f32 %v5559_v33, %v2455_v39  ;;  %v2407_v12 = vsub.f32 2.0, %v2343_v30  ;;  %4705 = vrcp.f32 %v2100_v4  ;;  %4320 = vmatprep.subr.bf16.mxu1 %v6283_v9  ;;  %v3370_v33 = vld [vmem:[%s6152_s10 + $0x28] sm:$0xff]  ;;  %v3439_v30 = vld [vmem:[%s6154_s12 + $0x10] sm:$0xff] }
 0x3e4   : > { %v4696_v1 = vpop.eup %4695  ;;  %v2518_v51 = vmul.f32 %v5563_v37, %v2454_v53  ;;  %v2406_v17 = vsub.f32 2.0, %v2342_v18  ;;  %3390 = vperm.xlu1 %4506, %v3368_v11   ;;  %3395 = vperm.xlu0 %4505, %v3369_v38  }
 0x3e5   : > { %v4698_v25 = vpop.eup %4697  ;;  %v2471_v14 = vmul.f32 %v4692_v57, %v2407_v12  ;;  %v2329_v3 = vmul.f32 %v4696_v1, %v2097_v50  ;;  %4351 = vmatpush3.bf16.xpose.msk.msra.mxu0 %vm5802_vm4, %v4349_v23  ;;  %v2151_v6 = vpop.xlane.xlu0 %2150 }
 0x3e6   : > { %v4321_v26 = vpack.c.bf16 %v2519_v45, %v2518_v51  ;;  %v2470_v37 = vmul.f32 %v4694_v59, %v2406_v17  ;;  %v2328_v63 = vmul.f32 %v4698_v25, %v2094_v61  ;;  %4707 = vrcp.f32 %v2151_v6  ;;  %v2148_v56 = vpop.xlane.xlu1 %2147  ;;  %4352 = vmatprep.subr.bf16.mxu0 %v6283_v9  ;;  %v3372_v61 = vld [vmem:[%s6152_s10 + $0x38] sm:$0xff] }
 0x3e7   : > { %v2535_v50 = vmul.f32 %v5569_v19, %v2471_v14  ;;  %v2393_v8 = vsub.f32 2.0, %v2329_v3  ;;  %4709 = vrcp.f32 %v2148_v56  ;;  %v3437_v19 = vld [vmem:[%s6154_s12] sm:$0xff] }
 0x3e8   : > { %v4700_v24 = vpop.eup %4699  ;;  %v2534_v52 = vmul.f32 %v5573_v46, %v2470_v37  ;;  %v2392_v44 = vsub.f32 2.0, %v2328_v63  ;;  %3400 = vperm.xlu1 %4506, %v3370_v33   ;;  %3405 = vperm.xlu0 %4505, %v3371_v27  }
 0x3e9   : > { %v4702_v20 = vpop.eup %4701  ;;  %v2457_v5 = vmul.f32 %v4696_v1, %v2393_v8  ;;  %v2345_v0 = vmul.f32 %v4700_v24, %v2145_v55  ;;  %v2109_v60 = vpop.xlane.xlu0 %2108 }
 0x3ea   : > { %v4353_v10 = vpack.c.bf16 %v2535_v50, %v2534_v52  ;;  %v2456_v35 = vmul.f32 %v4698_v25, %v2392_v44  ;;  %v2344_v16 = vmul.f32 %v4702_v20, %v2142_v13  ;;  %4323 = vmatpush3.bf16.xpose.msk.msra.mxu1 %vm5802_vm4, %v4321_v26  ;;  %4711 = vrcp.f32 %v2109_v60  ;;  %v2106_v46 = vpop.xlane.xlu1 %2105 }
 0x3eb   : > { %v2521_v28 = vmul.f32 %v5579_v47, %v2457_v5  ;;  %v2409_v55 = vsub.f32 2.0, %v2345_v0  ;;  %4713 = vrcp.f32 %v2106_v46  ;;  %4324 = vmatprep.subr.bf16.mxu1 %v6283_v9  ;;  %v3438_v47 = vld [vmem:[%s6154_s12 + $0x8] sm:$0xff] }
 0x3ec   : > { %v4704_v42 = vpop.eup %4703  ;;  %v2520_v57 = vmul.f32 %v5583_v49, %v2456_v35  ;;  %v2408_v29 = vsub.f32 2.0, %v2344_v16  ;;  %3410 = vperm.xlu1 %4506, %v3372_v61   ;;  %3443 = vperm.xlu0 %4505, %v3437_v19  }
 0x3ed   : > { %v4706_v36 = vpop.eup %4705  ;;  %v2473_v59 = vmul.f32 %v4700_v24, %v2409_v55  ;;  %v2331_v13 = vmul.f32 %v4704_v42, %v2103_v41  ;;  %4355 = vmatpush3.bf16.xpose.msk.msra.mxu0 %vm5802_vm4, %v4353_v10  ;;  %v2157_v39 = vpop.xlane.xlu0 %2156 }
 0x3ee   : > { %v4325_v11 = vpack.c.bf16 %v2521_v28, %v2520_v57  ;;  %v2472_v49 = vmul.f32 %v4702_v20, %v2408_v29  ;;  %v2330_v38 = vmul.f32 %v4706_v36, %v2100_v4  ;;  %4715 = vrcp.f32 %v2157_v39  ;;  %v2154_v23 = vpop.xlane.xlu1 %2153  ;;  %4356 = vmatprep.subr.bf16.mxu0 %v6283_v9  ;;  %v3440_v4 = vld [vmem:[%s6154_s12 + $0x18] sm:$0xff] }
 0x3ef   : > { %v2537_v41 = vmul.f32 %v5591_v43, %v2473_v59  ;;  %v2395_v53 = vsub.f32 2.0, %v2331_v13  ;;  %4717 = vrcp.f32 %v2154_v23 }
 0x3f0   : > { %v4708_v18 = vpop.eup %4707  ;;  %v2536_v45 = vmul.f32 %v5595_v54, %v2472_v49  ;;  %v2394_v12 = vsub.f32 2.0, %v2330_v38  ;;  %3448 = vperm.xlu1 %4506, %v3438_v47   ;;  %3453 = vperm.xlu0 %4505, %v3439_v30  }
 0x3f1   : > { %v4710_v1 = vpop.eup %4709  ;;  %v2459_v51 = vmul.f32 %v4704_v42, %v2395_v53  ;;  %v2347_v17 = vmul.f32 %v4708_v18, %v2151_v6 }
 0x3f2   : > { %v4357_v25 = vpack.c.bf16 %v2537_v41, %v2536_v45  ;;  %v2458_v14 = vmul.f32 %v4706_v36, %v2394_v12  ;;  %v2346_v3 = vmul.f32 %v4710_v1, %v2148_v56  ;;  %4327 = vmatpush3.bf16.xpose.msk.msra.mxu1 %vm5802_vm4, %v4325_v11 }
 0x3f3   : > { %v2523_v43 = vmul.f32 %v5599_v7, %v2459_v51  ;;  %v2411_v33 = vsub.f32 2.0, %v2347_v17  ;;  %4328 = vmatprep.subr.bf16.mxu1 %v6283_v9 }
 0x3f4   : > { %v4712_v54 = vpop.eup %4711  ;;  %v2522_v27 = vmul.f32 %v5603_v34, %v2458_v14  ;;  %v2410_v26 = vsub.f32 2.0, %v2346_v3  ;;  %3458 = vperm.xlu1 %4506, %v3440_v4  }
 0x3f5   : > { %v4714_v6 = vpop.eup %4713  ;;  %v2475_v37 = vmul.f32 %v4708_v18, %v2411_v33  ;;  %v2333_v63 = vmul.f32 %v4712_v54, %v2109_v60  ;;  %4359 = vmatpush3.bf16.xpose.msk.msra.mxu0 %vm5802_vm4, %v4357_v25 }
 0x3f6   : > { %v4329_v56 = vpack.c.bf16 %v2523_v43, %v2522_v27  ;;  %v2474_v50 = vmul.f32 %v4710_v1, %v2410_v26  ;;  %v2332_v8 = vmul.f32 %v4714_v6, %v2106_v46  ;;  %4360 = vmatprep.subr.bf16.mxu0 %v6283_v9 }
 0x3f7   : > { %v2539_v7 = vmul.f32 %v5607_v32, %v2475_v37  ;;  %v2397_v24 = vsub.f32 2.0, %v2333_v63 }
 0x3f8   : > { %v4716_v52 = vpop.eup %4715  ;;  %v2538_v44 = vmul.f32 %v5611_v48, %v2474_v50  ;;  %v2396_v34 = vsub.f32 2.0, %v2332_v8 }
 0x3f9   : > { %v4718_v20 = vpop.eup %4717  ;;  %v2461_v5 = vmul.f32 %v4712_v54, %v2397_v24  ;;  %v2349_v0 = vmul.f32 %v4716_v52, %v2157_v39 }
 0x3fa   : > { %v4361_v61 = vpack.c.bf16 %v2539_v7, %v2538_v44  ;;  %v2460_v60 = vmul.f32 %v4714_v6, %v2396_v34  ;;  %v2348_v19 = vmul.f32 %v4718_v20, %v2154_v23  ;;  %4331 = vmatpush3.bf16.xpose.msk.msra.mxu1 %vm5802_vm4, %v4329_v56 }
 0x3fb   : > { %v2525_v10 = vmul.f32 %v5615_v22, %v2461_v5  ;;  %v2413_v35 = vsub.f32 2.0, %v2349_v0  ;;  %4332 = vmatprep.subr.bf16.mxu1 %v6283_v9  ;;  %v772_v22 = vld [vmem:[#allocation2 + $0x20] sm:$0xff] }
 0x3fc   : > { %v2524_v32 = vmul.f32 %v5619_v40, %v2460_v60  ;;  %v2412_v16 = vsub.f32 2.0, %v2348_v19  ;;  %v6284_v40 = vmov 0.0  }
 0x3fd   : > { %v2477_v46 = vmul.f32 %v4716_v52, %v2413_v35  ;;  %4363 = vmatpush3.bf16.xpose.msk.msra.mxu0 %vm5802_vm4, %v4361_v61  ;;  %v6285_v52 = vld [vmem:[#allocation16_spill] sm:$0xff] }
 0x3fe   : > { %v4333_v48 = vpack.c.bf16 %v2525_v10, %v2524_v32  ;;  %v2476_v28 = vmul.f32 %v4718_v20, %v2412_v16  ;;  %4364 = vmatprep.subr.bf16.mxu0 %v6283_v9  ;;  %v6286_v10 = vld [vmem:[#allocation17_spill] sm:$0xff] }
 0x3ff   : > { %v2541_v55 = vmul.f32 %v5623_v62, %v2477_v46  ;;  %v773_v62 = vld [vmem:[#allocation2 + $0x28] sm:$0xff]  ;;  %v6287_v46 = vld [vmem:[#allocation18_spill] sm:$0xff] }
 0x400   : > { %v2540_v42 = vmul.f32 %v5627_v31, %v2476_v28 }
 0x402   : > { %v4365_v57 = vpack.c.bf16 %v2541_v55, %v2540_v42  ;;  %4335 = vmatpush3.bf16.xpose.msk.msra.mxu1 %vm5802_vm4, %v4333_v48 }
 0x403   : > { %4368 = vmatprep.subr.bf16.mxu1 %v6283_v9 }
 0x405   : > { %4367 = vmatpush3.bf16.xpose.msk.msra.mxu0 %vm5802_vm4, %v4365_v57 }
 0x406   : > { %4400 = vmatprep.subr.bf16.mxu0 %v6283_v9 }
 0x409   : > { %4153 = vmatmul.mubr.msk.f32.vlgmr.msra.gmra.mrb[40].mxu1 %vm665_vm1, %v772_v22 }
 0x40a   : > { %4222 = vmatprep.mubr.msk.f32.mxu1 %vm4869_vm3, %v6284_v40 }
 0x40c   : > { %4188 = vmatmul.mubr.msk.f32.vlgmr.msra.gmra.mrb[36].mxu0 %vm665_vm1, %v773_v62 }
 0x40d   : > { %4257 = vmatprep.mubr.msk.f32.mxu0 %vm4869_vm3, %v6284_v40 }
 0x40f   : > { %v2163_v31 = vpop.xlane.xlu0 %2162 }
 0x410   : > { %4719 = vrcp.f32 %v2163_v31  ;;  %v2160_v29 = vpop.xlane.xlu1 %2159 }
 0x411   : > { %4721 = vrcp.f32 %v2160_v29 }
 0x413   : > { %v2211_v36 = vpop.xlane.xlu0 %2210 }
 0x414   : > { %4723 = vrcp.f32 %v2211_v36  ;;  %v2208_v59 = vpop.xlane.xlu1 %2207 }
 0x415   : > { %4725 = vrcp.f32 %v2208_v59 }
 0x417   : > { %v2169_v13 = vpop.xlane.xlu0 %2168 }
 0x418   : > { %4727 = vrcp.f32 %v2169_v13  ;;  %v2166_v39 = vpop.xlane.xlu1 %2165 }
 0x419   : > { %4729 = vrcp.f32 %v2166_v39 }
 0x41a   : > { %v4720_v47 = vpop.eup %4719 }
 0x41b   : > { %v4722_v30 = vpop.eup %4721  ;;  %v2351_v11 = vmul.f32 %v4720_v47, %v2163_v31  ;;  %v2217_v49 = vpop.xlane.xlu0 %2216 }
 0x41c   : > { %v2350_v38 = vmul.f32 %v4722_v30, %v2160_v29  ;;  %4731 = vrcp.f32 %v2217_v49  ;;  %v2214_v23 = vpop.xlane.xlu1 %2213 }
 0x41d   : > { %v2415_v41 = vsub.f32 2.0, %v2351_v11  ;;  %4733 = vrcp.f32 %v2214_v23 }
 0x41e   : > { %v4724_v53 = vpop.eup %4723  ;;  %v2414_v18 = vsub.f32 2.0, %v2350_v38 }
 0x41f   : > { %v4726_v45 = vpop.eup %4725  ;;  %v2479_v12 = vmul.f32 %v4720_v47, %v2415_v41  ;;  %v2367_v1 = vmul.f32 %v4724_v53, %v2211_v36  ;;  %v2175_v51 = vpop.xlane.xlu0 %2174  ;;  %v6288_v36 = vld [vmem:[#allocation19_spill] sm:$0xff]  ;;  %v6289_v47 = vld [vmem:[#allocation20_spill] sm:$0xff] }
 0x420   : > { %v2478_v17 = vmul.f32 %v4722_v30, %v2414_v18  ;;  %v2366_v4 = vmul.f32 %v4726_v45, %v2208_v59  ;;  %4735 = vrcp.f32 %v2175_v51  ;;  %v2172_v25 = vpop.xlane.xlu1 %2171 }
 0x421   : > { %v2543_v14 = vmul.f32 %v5641_v21, %v2479_v12  ;;  %v2431_v3 = vsub.f32 2.0, %v2367_v1  ;;  %4737 = vrcp.f32 %v2172_v25  ;;  %v6290_v1 = vld [vmem:[#allocation21_spill] sm:$0xff] }
 0x422   : > { %v4728_v43 = vpop.eup %4727  ;;  %v2542_v33 = vmul.f32 %v5643_v58, %v2478_v17  ;;  %v2430_v54 = vsub.f32 2.0, %v2366_v4 }
 0x423   : > { %v4730_v27 = vpop.eup %4729  ;;  %v2495_v26 = vmul.f32 %v4724_v53, %v2431_v3  ;;  %v2353_v6 = vmul.f32 %v4728_v43, %v2169_v13  ;;  %v2223_v37 = vpop.xlane.xlu0 %2222 }
 0x424   : > { %v4369_v63 = vpack.c.bf16 %v2543_v14, %v2542_v33  ;;  %v2494_v56 = vmul.f32 %v4726_v45, %v2430_v54  ;;  %v2352_v50 = vmul.f32 %v4730_v27, %v2166_v39  ;;  %4739 = vrcp.f32 %v2223_v37  ;;  %v2220_v8 = vpop.xlane.xlu1 %2219 }
 0x425   : > { %v2559_v7 = vmul.f32 %v5651_v2, %v2495_v26  ;;  %v2417_v24 = vsub.f32 2.0, %v2353_v6  ;;  %4741 = vrcp.f32 %v2220_v8 }
 0x426   : > { %v4732_v21 = vpop.eup %4731  ;;  %v2558_v44 = vmul.f32 %v6285_v52, %v2494_v56  ;;  %v2416_v34 = vsub.f32 2.0, %v2352_v50  ;;  %4371 = vmatpush3.bf16.xpose.msk.msra.mxu1 %vm5802_vm4, %v4369_v63  ;;  %v6292_v56 = vld [vmem:[#allocation23_spill] sm:$0xff] }
 0x427   : > { %v4734_v58 = vpop.eup %4733  ;;  %v2481_v20 = vmul.f32 %v4728_v43, %v2417_v24  ;;  %v2369_v5 = vmul.f32 %v4732_v21, %v2217_v49  ;;  %v2181_v0 = vpop.xlane.xlu0 %2180  ;;  %4372 = vmatprep.subr.bf16.mxu1 %v6283_v9  ;;  %v6293_v24 = vld [vmem:[#allocation24_spill] sm:$0xff] }
 0x428   : > { %v4401_v61 = vpack.c.bf16 %v2559_v7, %v2558_v44  ;;  %v2480_v60 = vmul.f32 %v4730_v27, %v2416_v34  ;;  %v2368_v19 = vmul.f32 %v4734_v58, %v2214_v23  ;;  %4743 = vrcp.f32 %v2181_v0  ;;  %v2178_v2 = vpop.xlane.xlu1 %2177 }
 0x429   : > { %v2545_v35 = vmul.f32 %v6286_v10, %v2481_v20  ;;  %v2433_v32 = vsub.f32 2.0, %v2369_v5  ;;  %4745 = vrcp.f32 %v2178_v2 }
 0x42a   : > { %v4736_v16 = vpop.eup %4735  ;;  %v2544_v48 = vmul.f32 %v6287_v46, %v2480_v60  ;;  %v2432_v28 = vsub.f32 2.0, %v2368_v19  ;;  %4403 = vmatpush3.bf16.xpose.msk.msra.mxu0 %vm5802_vm4, %v4401_v61  ;;  %v6294_v19 = vld [vmem:[#allocation25_spill] sm:$0xff] }
 0x42b   : > { %v4738_v55 = vpop.eup %4737  ;;  %v2497_v42 = vmul.f32 %v4732_v21, %v2433_v32  ;;  %v2355_v57 = vmul.f32 %v4736_v16, %v2175_v51  ;;  %v2229_v22 = vpop.xlane.xlu0 %2228  ;;  %4404 = vmatprep.subr.bf16.mxu0 %v6283_v9  ;;  %v6295_v32 = vld [vmem:[#allocation26_spill] sm:$0xff] }
 0x42c   : > { %v4373_v40 = vpack.c.bf16 %v2545_v35, %v2544_v48  ;;  %v2496_v62 = vmul.f32 %v4734_v58, %v2432_v28  ;;  %v2354_v31 = vmul.f32 %v4738_v55, %v2172_v25  ;;  %4747 = vrcp.f32 %v2229_v22  ;;  %v2226_v29 = vpop.xlane.xlu1 %2225  ;;  %v6291_v25 = vld [vmem:[#allocation22_spill] sm:$0xff] }
 0x42d   : > { %v2561_v59 = vmul.f32 %v6288_v36, %v2497_v42  ;;  %v2419_v13 = vsub.f32 2.0, %v2355_v57  ;;  %4749 = vrcp.f32 %v2226_v29 }
 0x42e   : > { %v4740_v39 = vpop.eup %4739  ;;  %v2560_v30 = vmul.f32 %v6289_v47, %v2496_v62  ;;  %v2418_v11 = vsub.f32 2.0, %v2354_v31  ;;  %4375 = vmatpush3.bf16.xpose.msk.msra.mxu1 %vm5802_vm4, %v4373_v40  ;;  %v6296_v31 = vld [vmem:[#allocation27_spill] sm:$0xff] }
 0x42f   : > { %v4742_v49 = vpop.eup %4741  ;;  %v2483_v38 = vmul.f32 %v4736_v16, %v2419_v13  ;;  %v2371_v23 = vmul.f32 %v4740_v39, %v2223_v37  ;;  %v2187_v41 = vpop.xlane.xlu0 %2186  ;;  %4376 = vmatprep.subr.bf16.mxu1 %v6283_v9  ;;  %v6297_v13 = vld [vmem:[#allocation28_spill] sm:$0xff] }
 0x430   : > { %v4405_v53 = vpack.c.bf16 %v2561_v59, %v2560_v30  ;;  %v2482_v18 = vmul.f32 %v4738_v55, %v2418_v11  ;;  %v2370_v45 = vmul.f32 %v4742_v49, %v2220_v8  ;;  %4751 = vrcp.f32 %v2187_v41  ;;  %v2184_v12 = vpop.xlane.xlu1 %2183 }
 0x431   : > { %v2547_v51 = vmul.f32 %v6290_v1, %v2483_v38  ;;  %v2435_v17 = vsub.f32 2.0, %v2371_v23  ;;  %4753 = vrcp.f32 %v2184_v12 }
 0x432   : > { %v4744_v4 = vpop.eup %4743  ;;  %v2546_v14 = vmul.f32 %v6291_v25, %v2482_v18  ;;  %v2434_v3 = vsub.f32 2.0, %v2370_v45  ;;  %4407 = vmatpush3.bf16.xpose.msk.msra.mxu0 %vm5802_vm4, %v4405_v53  ;;  %v6298_v45 = vld [vmem:[#allocation29_spill] sm:$0xff] }
 0x433   : > { %v4746_v43 = vpop.eup %4745  ;;  %v2499_v33 = vmul.f32 %v4740_v39, %v2435_v17  ;;  %v2357_v54 = vmul.f32 %v4744_v4, %v2181_v0  ;;  %v2235_v27 = vpop.xlane.xlu0 %2234  ;;  %4408 = vmatprep.subr.bf16.mxu0 %v6283_v9  ;;  %v6299_v17 = vld [vmem:[#allocation30_spill] sm:$0xff] }
 0x434   : > { %v4377_v26 = vpack.c.bf16 %v2547_v51, %v2546_v14  ;;  %v2498_v6 = vmul.f32 %v4742_v49, %v2434_v3  ;;  %v2356_v37 = vmul.f32 %v4746_v43, %v2178_v2  ;;  %4755 = vrcp.f32 %v2235_v27  ;;  %v2232_v63 = vpop.xlane.xlu1 %2231 }
 0x435   : > { %v2563_v50 = vmul.f32 %v6292_v56, %v2499_v33  ;;  %v2421_v8 = vsub.f32 2.0, %v2357_v54  ;;  %4757 = vrcp.f32 %v2232_v63 }
 0x436   : > { %v4748_v7 = vpop.eup %4747  ;;  %v2562_v21 = vmul.f32 %v6293_v24, %v2498_v6  ;;  %v2420_v52 = vsub.f32 2.0, %v2356_v37  ;;  %4379 = vmatpush3.bf16.xpose.msk.msra.mxu1 %vm5802_vm4, %v4377_v26  ;;  %v6300_v37 = vld [vmem:[#allocation31_spill] sm:$0xff] }
 0x437   : > { %v4750_v44 = vpop.eup %4749  ;;  %v2485_v34 = vmul.f32 %v4744_v4, %v2421_v8  ;;  %v2373_v58 = vmul.f32 %v4748_v7, %v2229_v22  ;;  %v2193_v20 = vpop.xlane.xlu0 %2192  ;;  %4380 = vmatprep.subr.bf16.mxu1 %v6283_v9  ;;  %v6301_v8 = vld [vmem:[#allocation32_spill] sm:$0xff] }
 0x438   : > { %v4409_v5 = vpack.c.bf16 %v2563_v50, %v2562_v21  ;;  %v2484_v0 = vmul.f32 %v4746_v43, %v2420_v52  ;;  %v2372_v61 = vmul.f32 %v4750_v44, %v2226_v29  ;;  %4759 = vrcp.f32 %v2193_v20  ;;  %v2190_v60 = vpop.xlane.xlu1 %2189 }
 0x439   : > { %v2549_v2 = vmul.f32 %v6294_v19, %v2485_v34  ;;  %v2437_v10 = vsub.f32 2.0, %v2373_v58  ;;  %4761 = vrcp.f32 %v2190_v60 }
 0x43a   : > { %v4752_v35 = vpop.eup %4751  ;;  %v2548_v16 = vmul.f32 %v6295_v32, %v2484_v0  ;;  %v2436_v46 = vsub.f32 2.0, %v2372_v61  ;;  %4411 = vmatpush3.bf16.xpose.msk.msra.mxu0 %vm5802_vm4, %v4409_v5  ;;  %v6302_v61 = vld [vmem:[#allocation33_spill] sm:$0xff] }
 0x43b   : > { %v4754_v48 = vpop.eup %4753  ;;  %v2501_v28 = vmul.f32 %v4748_v7, %v2437_v10  ;;  %v2359_v55 = vmul.f32 %v4752_v35, %v2187_v41  ;;  %v2241_v42 = vpop.xlane.xlu0 %2240  ;;  %4412 = vmatprep.subr.bf16.mxu0 %v6283_v9  ;;  %v6303_v10 = vld [vmem:[#allocation34_spill] sm:$0xff] }
 0x43c   : > { %v4381_v57 = vpack.c.bf16 %v2549_v2, %v2548_v16  ;;  %v2500_v22 = vmul.f32 %v4750_v44, %v2436_v46  ;;  %v2358_v40 = vmul.f32 %v4754_v48, %v2184_v12  ;;  %4763 = vrcp.f32 %v2241_v42  ;;  %v2238_v62 = vpop.xlane.xlu1 %2237 }
 0x43d   : > { %v2565_v29 = vmul.f32 %v6296_v31, %v2501_v28  ;;  %v2423_v36 = vsub.f32 2.0, %v2359_v55  ;;  %4765 = vrcp.f32 %v2238_v62 }
 0x43e   : > { %v4756_v59 = vpop.eup %4755  ;;  %v2564_v39 = vmul.f32 %v6297_v13, %v2500_v22  ;;  %v2422_v47 = vsub.f32 2.0, %v2358_v40  ;;  %4383 = vmatpush3.bf16.xpose.msk.msra.mxu1 %vm5802_vm4, %v4381_v57  ;;  %v6304_v40 = vld [vmem:[#allocation35_spill] sm:$0xff] }
 0x43f   : > { %v4758_v30 = vpop.eup %4757  ;;  %v2487_v11 = vmul.f32 %v4752_v35, %v2423_v36  ;;  %v2375_v49 = vmul.f32 %v4756_v59, %v2235_v27  ;;  %v2199_v38 = vpop.xlane.xlu0 %2198  ;;  %4384 = vmatprep.subr.bf16.mxu1 %v6283_v9  ;;  %v6305_v36 = vld [vmem:[#allocation36_spill] sm:$0xff] }
 0x440   : > { %v4413_v23 = vpack.c.bf16 %v2565_v29, %v2564_v39  ;;  %v2486_v41 = vmul.f32 %v4754_v48, %v2422_v47  ;;  %v2374_v53 = vmul.f32 %v4758_v30, %v2232_v63  ;;  %4767 = vrcp.f32 %v2199_v38  ;;  %v2196_v18 = vpop.xlane.xlu1 %2195 }
 0x441   : > { %v2551_v12 = vmul.f32 %v6298_v45, %v2487_v11  ;;  %v2439_v1 = vsub.f32 2.0, %v2375_v49  ;;  %4769 = vrcp.f32 %v2196_v18  ;;  %v6307_v45 = vld [vmem:[#allocation14_spill] sm:$0xff] }
 0x442   : > { %v4760_v51 = vpop.eup %4759  ;;  %v2550_v4 = vmul.f32 %v6299_v17, %v2486_v41  ;;  %v2438_v25 = vsub.f32 2.0, %v2374_v53  ;;  %4415 = vmatpush3.bf16.xpose.msk.msra.mxu0 %vm5802_vm4, %v4413_v23  ;;  %v6306_v41 = vld [vmem:[#allocation37_spill] sm:$0xff] }
 0x443   : > { %v4762_v14 = vpop.eup %4761  ;;  %v2503_v3 = vmul.f32 %v4756_v59, %v2439_v1  ;;  %v2361_v43 = vmul.f32 %v4760_v51, %v2193_v20  ;;  %v2247_v33 = vpop.xlane.xlu0 %2246  ;;  %4416 = vmatprep.subr.bf16.mxu0 %v6283_v9 }
 0x444   : > { %v4385_v54 = vpack.c.bf16 %v2551_v12, %v2550_v4  ;;  %v2502_v27 = vmul.f32 %v4758_v30, %v2438_v25  ;;  %v2360_v26 = vmul.f32 %v4762_v14, %v2190_v60  ;;  %4771 = vrcp.f32 %v2247_v33  ;;  %v2244_v6 = vpop.xlane.xlu1 %2243 }
 0x445   : > { %v2567_v63 = vmul.f32 %v6300_v37, %v2503_v3  ;;  %v2425_v56 = vsub.f32 2.0, %v2361_v43  ;;  %4773 = vrcp.f32 %v2244_v6  ;;  %v6310_v37 = vld [vmem:[#allocation39_spill] sm:$0xff] }
 0x446   : > { %v4764_v50 = vpop.eup %4763  ;;  %v2566_v7 = vmul.f32 %v6301_v8, %v2502_v27  ;;  %v2424_v24 = vsub.f32 2.0, %v2360_v26  ;;  %4387 = vmatpush3.bf16.xpose.msk.msra.mxu1 %vm5802_vm4, %v4385_v54  ;;  %v6309_v26 = vld [vmem:[#allocation15_spill] sm:$0xff]  ;;  %v6311_v8 = vld [vmem:[#allocation40_spill] sm:$0xff] }
 0x447   : > { %v4766_v21 = vpop.eup %4765  ;;  %v2489_v52 = vmul.f32 %v4760_v51, %v2425_v56  ;;  %v2377_v44 = vmul.f32 %v4764_v50, %v2241_v42  ;;  %v2205_v34 = vpop.xlane.xlu0 %2204  ;;  %4388 = vmatprep.subr.bf16.mxu1 %v6283_v9  ;;  %v6308_v51 = vld [vmem:[#allocation38_spill] sm:$0xff] }
 0x448   : > { %v4417_v58 = vpack.c.bf16 %v2567_v63, %v2566_v7  ;;  %v2488_v20 = vmul.f32 %v4762_v14, %v2424_v24  ;;  %v2376_v5 = vmul.f32 %v4766_v21, %v2238_v62  ;;  %4775 = vrcp.f32 %v2205_v34  ;;  %v2202_v0 = vpop.xlane.xlu1 %2201 }
 0x449   : > { %v2553_v60 = vmul.f32 %v6302_v61, %v2489_v52  ;;  %v2441_v19 = vsub.f32 2.0, %v2377_v44  ;;  %4777 = vrcp.f32 %v2202_v0 }
 0x44a   : > { %v4768_v2 = vpop.eup %4767  ;;  %v2552_v35 = vmul.f32 %v6303_v10, %v2488_v20  ;;  %v2440_v32 = vsub.f32 2.0, %v2376_v5  ;;  %4419 = vmatpush3.bf16.xpose.msk.msra.mxu0 %vm5802_vm4, %v4417_v58  ;;  %v6312_v5 = vld [vmem:[#allocation41_spill] sm:$0xff] }
 0x44b   : > { %v4770_v16 = vpop.eup %4769  ;;  %v2505_v46 = vmul.f32 %v4764_v50, %v2441_v19  ;;  %v2363_v48 = vmul.f32 %v4768_v2, %v2199_v38  ;;  %v2253_v28 = vpop.xlane.xlu0 %2252  ;;  %4420 = vmatprep.subr.bf16.mxu0 %v6283_v9 }
 0x44c   : > { %v4389_v55 = vpack.c.bf16 %v2553_v60, %v2552_v35  ;;  %v2504_v42 = vmul.f32 %v4766_v21, %v2440_v32  ;;  %v2362_v57 = vmul.f32 %v4770_v16, %v2196_v18  ;;  %4779 = vrcp.f32 %v2253_v28  ;;  %v2250_v22 = vpop.xlane.xlu1 %2249  ;;  %v6313_v60 = vld [vmem:[#allocation42_spill] sm:$0xff] }
 0x44d   : > { %v2569_v62 = vmul.f32 %v6304_v40, %v2505_v46  ;;  %v2427_v31 = vsub.f32 2.0, %v2363_v48  ;;  %4781 = vrcp.f32 %v2250_v22  ;;  %v6315_v48 = vld [vmem:[#allocation44_spill] sm:$0xff] }
 0x44e   : > { %v4772_v29 = vpop.eup %4771  ;;  %v2568_v59 = vmul.f32 %v6305_v36, %v2504_v42  ;;  %v2426_v13 = vsub.f32 2.0, %v2362_v57  ;;  %4391 = vmatpush3.bf16.xpose.msk.msra.mxu1 %vm5802_vm4, %v4389_v55 }
 0x44f   : > { %v4774_v39 = vpop.eup %4773  ;;  %v2491_v47 = vmul.f32 %v4768_v2, %v2427_v31  ;;  %v2379_v30 = vmul.f32 %v4772_v29, %v2247_v33  ;;  %4392 = vmatprep.subr.bf16.mxu1 %v6283_v9 }
 0x450   : > { %v4421_v11 = vpack.c.bf16 %v2569_v62, %v2568_v59  ;;  %v2490_v49 = vmul.f32 %v4770_v16, %v2426_v13  ;;  %v2378_v38 = vmul.f32 %v4774_v39, %v2244_v6  ;;  %v548_v23 = vpop.permute.xlu1 %547  ;;  %v6314_v16 = vld [vmem:[#allocation43_spill] sm:$0xff] }
 0x451   : > { %v2555_v53 = vmul.f32 %v6306_v41, %v2491_v47  ;;  %v2443_v18 = vsub.f32 2.0, %v2379_v30  ;;  %v659_v12 = vadd.f32 %v6307_v45, %v548_v23  ;;  %v4516_v47 = vld [vmem:[%s6148_s6 + $0x8] sm:$0xff]   ;;  %v4517_v30 = vld [vmem:[%s6151_s9] sm:$0xff]  }
 0x452   : > { %v4776_v1 = vpop.eup %4775  ;;  %v2554_v17 = vmul.f32 %v6308_v51, %v2490_v49  ;;  %v2442_v4 = vsub.f32 2.0, %v2378_v38  ;;  %4423 = vmatpush3.bf16.xpose.msk.msra.mxu0 %vm5802_vm4, %v4421_v11 }
 0x453   : > { %v4778_v25 = vpop.eup %4777  ;;  %v2507_v14 = vmul.f32 %v4772_v29, %v2443_v18  ;;  %v2365_v3 = vmul.f32 %v4776_v1, %v2205_v34  ;;  %672 = vst.msk [vmem:[#allocation2 + $0x30] sm:$0xff] %vm665_vm1, %v659_v12  ;;  %v553_v43 = vpop.permute.xlu0 %552  ;;  %4424 = vmatprep.subr.bf16.mxu0 %v6283_v9 }
 0x454   : > { %v4393_v33 = vpack.c.bf16 %v2555_v53, %v2554_v17  ;;  %v2506_v54 = vmul.f32 %v4774_v39, %v2442_v4  ;;  %v2364_v27 = vmul.f32 %v4778_v25, %v2202_v0  ;;  %v662_v6 = vadd.f32 %v6309_v26, %v553_v43  ;;  %v3071_v11 = vpop.permute.xlu1 %3070  ;;  %v6316_v43 = vld [vmem:[#allocation12_spill] sm:$0xff]  ;;  %v4522_v26 = vld [vmem:[%s6150_s8 + $0x8] sm:$0xff]  }
 0x455   : > { %v2571_v63 = vmul.f32 %v6310_v37, %v2507_v14  ;;  %v2429_v56 = vsub.f32 2.0, %v2365_v3  ;;  %v4518_v14 = vld [vmem:[%s6151_s9 + $0x8] sm:$0xff]   ;;  %v4519_v3 = vld [vmem:[%s6151_s9 + $0x10] sm:$0xff]   ;;  %v4524_v37 = vld [vmem:[%s6150_s8 + $0x18] sm:$0xff]  }
 0x456   : > { %v4780_v50 = vpop.eup %4779  ;;  %v2570_v7 = vmul.f32 %v6311_v8, %v2506_v54  ;;  %v2428_v24 = vsub.f32 2.0, %v2364_v27  ;;  %673 = vst.msk [vmem:[#allocation2 + $0x38] sm:$0xff] %vm665_vm1, %v662_v6  ;;  %4395 = vmatpush3.bf16.xpose.msk.msra.mxu1 %vm5802_vm4, %v4393_v33  ;;  %v6317_v33 = vld [vmem:[#allocation13_spill] sm:$0xff]  ;;  %v4520_v54 = vld [vmem:[%s6151_s9 + $0x18] sm:$0xff]   ;;  %v4521_v27 = vld [vmem:[%s6150_s8] sm:$0xff]  }
 0x457   : > { %v4782_v21 = vpop.eup %4781  ;;  %v2493_v52 = vmul.f32 %v4776_v1, %v2429_v56  ;;  %v2381_v44 = vmul.f32 %v4780_v50, %v2253_v28  ;;  %4396 = vmatprep.subr.bf16.mxu1 %v6283_v9  ;;  %v3081_v23 = vpop.permute.xlu0 %3080  ;;  %v4523_v6 = vld [vmem:[%s6150_s8 + $0x10] sm:$0xff]  }
 0x458   : > { %v4425_v34 = vpack.c.bf16 %v2571_v63, %v2570_v7  ;;  %v2492_v58 = vmul.f32 %v4778_v25, %v2428_v24  ;;  %v2380_v20 = vmul.f32 %v4782_v21, %v2250_v22  ;;  %v3076_v49 = vpop.permute.xlu1 %3075  ;;  %v4525_v63 = vld [vmem:[%s6153_s11] sm:$0xff]  }
 0x459   : > { %v2557_v0 = vmul.f32 %v6312_v5, %v2493_v52  ;;  %v2445_v61 = vsub.f32 2.0, %v2381_v44 }
 0x45a   : > { %v2556_v19 = vmul.f32 %v6313_v60, %v2492_v58  ;;  %v2444_v2 = vsub.f32 2.0, %v2380_v20  ;;  %4427 = vmatpush3.bf16.xpose.msk.msra.mxu0 %vm5802_vm4, %v4425_v34  ;;  %v774_v42 = vld [vmem:[#allocation2 + $0x30] sm:$0xff] }
 0x45b   : > { %v2509_v10 = vmul.f32 %v4780_v50, %v2445_v61  ;;  %4428 = vmatprep.subr.bf16.mxu0 %v6283_v9  ;;  %v4515_v9 = vld [vmem:[%s6148_s6] sm:$0xff]   ;;  %v3376_v56 = vpop.permute.xlu0 %3375 }
 0x45c   : > { %v4397_v35 = vpack.c.bf16 %v2557_v0, %v2556_v19  ;;  %v2508_v32 = vmul.f32 %v4782_v21, %v2444_v2  ;;  %v3086_v53 = vpop.permute.xlu1 %3085 }
 0x45d   : > { %v2573_v46 = vmul.f32 %v6314_v16, %v2509_v10  ;;  %v775_v57 = vld [vmem:[#allocation2 + $0x38] sm:$0xff] }
 0x45e   : > { %v2572_v28 = vmul.f32 %v6315_v48, %v2508_v32  ;;  %4399 = vmatpush3.bf16.xpose.msk.msra.mxu1 %vm5802_vm4, %v4397_v35 }
 0x45f   : > { %v3386_v8 = vpop.permute.xlu0 %3385 }
 0x460   : > { %v4429_v55 = vpack.c.bf16 %v2573_v46, %v2572_v28  ;;  %v3381_v50 = vpop.permute.xlu1 %3380 }
 0x462   : > { %4431 = vmatpush3.bf16.xpose.msk.msra.mxu0 %vm5802_vm4, %v4429_v55 }
 0x463   : > { %v3396_v44 = vpop.permute.xlu0 %3395 }
 0x464   : > { %v3391_v7 = vpop.permute.xlu1 %3390 }
 0x465   : > { %4223 = vmatmul.mubr.msk.f32.vlgmr.msra.gmra.mrb[42].mxu1 %vm665_vm1, %v774_v42 }
 0x466   : > { %4264 = vmatprep.mubr.msk.bf16.mxu1 %vm587_vm0, %v4515_v9 }
 0x467   : > { %v3406_v32 = vpop.permute.xlu0 %3405 }
 0x468   : > { %v3401_v0 = vpop.permute.xlu1 %3400 }
 0x469   : > { %4258 = vmatmul.mubr.msk.f32.vlgmr.msra.gmra.mrb[38].mxu0 %vm665_vm1, %v775_v57 }
 0x46a   : > { %4272 = vmatprep.mubr.msk.bf16.mxu0 %vm587_vm0, %v4517_v30 }
 0x46c   : > { %v3411_v55 = vpop.permute.xlu1 %3410 }
 0x4dc   : > { %v2691_v22 = vpop.f32.mrb[40].mxu1 }
 0x4dd   : > { %v4154_v40 = vpop.f32.mrb[41].mxu1 }
 0x4df   : > { %v2812_v62 = vpop.f32.mrb[36].mxu0 }
 0x4e0   : > { %v3062_v31 = vpack.c.bf16 %v2812_v62, %v2691_v22  ;;  %v4189_v29 = vpop.f32.mrb[37].mxu0 }
 0x4e2   : > { %4260 = vmatprep.subr.bf16.mxu1 %v3062_v31 }
 0x4e3   : > { %4261 = vmatpush3.bf16.msra.mxu1 %v3062_v31 }
 0x538   : > { %v2933_v15 = vpop.f32.mrb[42].mxu1 }
 0x539   : > { %v4224_v36 = vpop.f32.mrb[43].mxu1 }
 0x53c   : > { %v3054_v59 = vpop.f32.mrb[38].mxu0 }
 0x53d   : > { %v3063_v13 = vpack.c.bf16 %v3054_v59, %v2933_v15  ;;  %v4259_v39 = vpop.f32.mrb[39].mxu0 }
 0x53e   : > { %v3444_v39 = vpop.permute.xlu0 %3443 }
 0x53f   : > { %4262 = vmatprep.subr.bf16.mxu1 %v3063_v13 }
 0x540   : > { %4263 = vmatpush3.bf16.msra.mxu1 %v3063_v13  ;;  %v4526_v13 = vld [vmem:[%s6153_s11 + $0x8] sm:$0xff]  }
 0x542   : > { %v3454_v30 = vpop.permute.xlu0 %3453 }
 0x543   : > { %4265 = vmatmul.mubr.msk.bf16.vlgmr.msra.gmra.mrb[44].mxu1 %vm587_vm0, %v4516_v47  ;;  %v3449_v47 = vpop.permute.xlu1 %3448 }
 0x544   : > { %4300 = vmatprep.mubr.msk.bf16.mxu1 %vm3471_vm5, %v4525_v63 }
 0x616   : > { %v4266_v38 = vpop.f32.mrb[44].mxu1 }
 0x617   : > { %v3138_v41 = vpop.f32.mrb[45].mxu1  ;;  %v3147_v45 = vadd.f32 %v4266_v38, %v3081_v23  ;;  %v3459_v23 = vpop.permute.xlu1 %3458 }
 0x618   : > { %v4267_v18 = vpop.f32.mrb[46].mxu1  ;;  %v3139_v51 = vadd.f32 %v3138_v41, %v3071_v11 }
 0x619   : > { %v3150_v12 = vadd.f32 %v4267_v18, %v3086_v53  ;;  %v3141_v1 = vpop.f32.mrb[47].mxu1  ;;  %v4783_v18 = vld [vmem:[%s5017_s25 + $0x10] sm:$0xff] }
 0x61a   : > { %v3142_v17 = vadd.f32 %v3141_v1, %v3076_v49 }
 0x61b   : > { %v3170_v4 = vpack.c.bf16 %v3150_v12, %v3147_v45 }
 0x61c   : > { %v3169_v25 = vpack.c.bf16 %v3142_v17, %v3139_v51  ;;  %v4784_v51 = vld [vmem:[%s5017_s25] sm:$0xff] }
 0x61e   : > { %4268 = vmatprep.subr.bf16.mxu0 %v3169_v25 }
 0x61f   : > { %4269 = vmatpush3.bf16.msra.mxu0 %v3169_v25  ;;  %v4785_v25 = vld [vmem:[%s5017_s25 + $0x18] sm:$0xff] }
 0x620   : > { %4270 = vmatprep.subr.bf16.mxu0 %v3170_v4 }
 0x623   : > { %4271 = vmatpush3.bf16.msra.mxu0 %v3170_v4 }
 0x624   : > { %4280 = vmatprep.subr.bf16.mxu0 %v6316_v43 }
 0x626   : > { %4273 = vmatmul.mubr.msk.bf16.vlgmr.msra.gmra.mrb[40].mxu0 %vm587_vm0, %v4518_v14 }
 0x627   : > { %4276 = vmatprep.mubr.msk.bf16.mxu0 %vm587_vm0, %v4519_v3  ;;  %4281 = vmatpush3.bf16.msra.mxu0 %v6316_v43  ;;  %v4786_v3 = vld [vmem:[%s5017_s25 + $0x8] sm:$0xff]  ;;  %s4793_s25 = scalar_lea.vmem %s4792_s24, 1024 }
 0x628   : > { %4282 = vmatprep.subr.bf16.mxu0 %v6317_v33  ;;  %p4795_p2 = scmp.lt.s32.totalorder %s4793_s25, %s4787_s22 }
 0x62a   : > { %p4796_p3 = por %p4795_p2, %p4794_p1 }
 0x62b   : > { %4283 = vmatpush3.bf16.msra.mxu0 %v6317_v33 }
 0x62c   : > { %p4797_p5 = pnand %p4796_p3, %p4790_p0 }
 0x62e   : > { %4277 = vmatmul.mubr.msk.bf16.gmra.mrb[44].mxu0 %vm587_vm0, %v4520_v54 }
 0x62f   : > { %4284 = vmatprep.mubr.msk.bf16.mxu0 %vm587_vm0, %v4521_v27 }
 0x636   : > { %4285 = vmatmul.mubr.msk.bf16.vlgmr.msra.gmra.mrb[40].mxu0 %vm587_vm0, %v4522_v26 }
 0x637   : > { %4288 = vmatprep.mubr.msk.bf16.mxu0 %vm587_vm0, %v4523_v6 }
 0x63e   : > { %4289 = vmatmul.mubr.msk.bf16.gmra.mrb[44].mxu0 %vm587_vm0, %v4524_v37 }
 0x709   : > { %v4286_v24 = vpop.f32.mrb[40].mxu0 }
 0x70a   : > { %v3415_v21 = vadd.f32 %v4286_v24, %v3386_v8  ;;  %v3334_v52 = vpop.f32.mrb[41].mxu0 }
 0x70b   : > { %v3413_v34 = vadd.f32 %v3376_v56, %v3334_v52  ;;  %v4287_v58 = vpop.f32.mrb[42].mxu0 }
 0x70c   : > { %v3416_v20 = vadd.f32 %v4287_v58, %v3391_v7  ;;  %v3337_v5 = vpop.f32.mrb[43].mxu0  ;;  %v3423_v60 = vmax.f32 %v3415_v21, 0.0 }
 0x70d   : > { %v3414_v61 = vadd.f32 %v3381_v50, %v3337_v5  ;;  %v3421_v2 = vmax.f32 %v3413_v34, 0.0 }
 0x70e   : > { %v3424_v19 = vmax.f32 %v3416_v20, 0.0 }
 0x70f   : > { %v3422_v10 = vmax.f32 %v3414_v61, 0.0 }
 0x710   : > { %v3434_v35 = vpack.c.bf16 %v3424_v19, %v3423_v60 }
 0x711   : > { %v3433_v16 = vpack.c.bf16 %v3422_v10, %v3421_v2  ;;  %v4290_v46 = vpop.f32.mrb[44].mxu0 }
 0x712   : > { %v3419_v48 = vadd.f32 %v4290_v46, %v3406_v32  ;;  %v3350_v28 = vpop.f32.mrb[45].mxu0 }
 0x713   : > { %v3417_v42 = vadd.f32 %v3396_v44, %v3350_v28  ;;  %v4291_v57 = vpop.f32.mrb[46].mxu0  ;;  %4292 = vmatprep.subr.bf16.mxu1 %v3433_v16 }
 0x714   : > { %v3420_v9 = vadd.f32 %v4291_v57, %v3411_v55  ;;  %v3353_v22 = vpop.f32.mrb[47].mxu0  ;;  %4293 = vmatpush3.bf16.msra.mxu1 %v3433_v16  ;;  %v3427_v62 = vmax.f32 %v3419_v48, 0.0 }
 0x715   : > { %v3418_v40 = vadd.f32 %v3401_v0, %v3353_v22  ;;  %4294 = vmatprep.subr.bf16.mxu1 %v3434_v35  ;;  %v3425_v29 = vmax.f32 %v3417_v42, 0.0 }
 0x716   : > { %v3428_v31 = vmax.f32 %v3420_v9, 0.0 }
 0x717   : > { %v3426_v15 = vmax.f32 %v3418_v40, 0.0 }
 0x718   : > { %v3436_v36 = vpack.c.bf16 %v3428_v31, %v3427_v62  ;;  %4295 = vmatpush3.bf16.msra.mxu1 %v3434_v35 }
 0x719   : > { %v3435_v59 = vpack.c.bf16 %v3426_v15, %v3425_v29 }
 0x71b   : > { %4296 = vmatprep.subr.bf16.mxu1 %v3435_v59 }
 0x71c   : > { %4297 = vmatpush3.bf16.msra.mxu1 %v3435_v59 }
 0x71d   : > { %4298 = vmatprep.subr.bf16.mxu1 %v3436_v36 }
 0x720   : > { %4299 = vmatpush3.bf16.msra.mxu1 %v3436_v36 }
 0x723   : > { %4301 = vmatmul.mubr.msk.bf16.vlgmr.msra.gmra.mrb[48].mxu1 %vm3471_vm5, %v4526_v13 }
 0x7f6   : > { %v4302_v11 = vpop.f32.mrb[48].mxu1 }
 0x7f7   : > { %v3521_v49 = vadd.f32 %v4302_v11, %v3454_v30  ;;  %v3512_v38 = vpop.f32.mrb[49].mxu1 }
 0x7f8   : > { %v3513_v41 = vadd.f32 %v3512_v38, %v3444_v39  ;;  %v4303_v53 = vpop.f32.mrb[50].mxu1 }
 0x7f9   : > { %v3529_v45 = vadd.f32 %v4783_v18, %v3521_v49  ;;  %v3524_v12 = vadd.f32 %v4303_v53, %v3459_v23  ;;  %v3515_v1 = vpop.f32.mrb[51].mxu1 }
 0x7fa   : > { %v3527_v17 = vadd.f32 %v4784_v51, %v3513_v41  ;;  %v3516_v4 = vadd.f32 %v3515_v1, %v3449_v47 }
 0x7fb   : > { %3533 = vst [vmem:[%s470_s27 + $0x10] sm:$0xff] %v3529_v45  ;;  %v3530_v14 = vadd.f32 %v4785_v25, %v3524_v12 }
 0x7fc   : > { %3531 = vst [vmem:[%s470_s27] sm:$0xff] %v3527_v17  ;;  %v3528_v43 = vadd.f32 %v4786_v3, %v3516_v4 }
 0x7fd   : > { %3534 = vst [vmem:[%s470_s27 + $0x18] sm:$0xff] %v3530_v14 }
 0x7fe   : > { %3532 = vst [vmem:[%s470_s27 + $0x8] sm:$0xff] %v3528_v43 }
 0x7ff   : > { %4800 = shalt.err (!%p4797_p5)
}
 0x800   : > { %s4801_s19 = scalar_lea.hbm %s6092_s17, 512  ;;  %s4805_s27 = scalar_lea.hbm %s6155_s13, 1024 }
 0x801   : > { %p4802_p6 = scmp.ne.s32.totalorder %s6092_s17, %s4801_s19  ;;  %p4806_p10 = scmp.lt.u32.totalorder %s6092_s17, %s6155_s13 }
 0x802   : > { %p4807_p11 = scmp.lt.u32.totalorder %s4805_s27, %s4801_s19  ;;  %p4809_p13 = scmp.lt.u32.totalorder %s4801_s19, %s6092_s17 }
 0x803   : > { %p4803_p7 = pnand %p4802_p6, %p4984_p4 }
 0x804   : > { %p4808_p12 = por %p4807_p11, %p4806_p10 }
 0x805   : > { %p4804_p9 = pneg %p4803_p7 }
 0x806   : > { %p4810_p0 = por %p4809_p13, %p4808_p12 }
 0x808   : > { %p4811_p1 = pnand %p4810_p0, %p4804_p9 }
 0x80a   : > { %4814 = shalt.err (!%p4811_p1)
}
 0x80b   : > { %s4872_s15 = smov 128   ;;  %s4873_s22 = smov 8  }
 0x80c   : > { %4444 = dma.vmem_to_hbm [thread:$0]  (%p4984_p4), %s6085_s20, 512, %s6092_s17, %s6096_s28, %s4872_s15, %s4872_s15, %s4873_s22  }
 0x80d PF: > { %s6318_s23 = sld [smem:[#allocation6_spill]]  ;;  %p4450_p2 = scmp.ge.s32.totalorder %s4865_s30, 2 }
 0x80f   : > { %p4447_p3 = pnand %p4450_p2, %p4991_p8 }
 0x813   : > { %s3565_s25 = sand.u32 1, %s6318_s23  }
 0x814   : > { %s3566_s19 = scalar_lea.sflag [#allocation4], %s3565_s25 }
 0x815   : > { %4840 = dma.done.wait (!%p4447_p3), %s3566_s19, 512  }
 0x816   : > { %4842 = vsyncadd (!%p4447_p3), %s3566_s19, 4294966784  ;;  %s26_s30 = sadd.s32 1, %s4865_s30   ;;  %s6320_s29 = sld [smem:[#allocation7_spill]] }
 0x817   : > { %p23_p5 = scmp.ge.s32.totalorder %s26_s30, 4   ;;  %s6321_s27 = sld [smem:[#allocation11_spill]] }
 0x818   : > { %s6322_s28 = sld [smem:[#allocation8_spill]]  ;;  %s6323_s18 = sld [smem:[#allocation9_spill]] }
 0x819   : > { %s6324_s25 = smov %s4849_s26  ;;  %25 = sbr.rel (!%p23_p5) target bundleno = 4 (0x4), region = 114 }
 0x81c   : > { %s6325_s26 = smov %s6320_s29 }
 0x81e   : > { %s6326_s29 = smov %s6323_s18 }
 0x820   :  { %3571 = vsyncpa [#allocation4], 1 }
 0x821   :  { %3573 = vsyncpa [#allocation4 + $0x1], 1 }

</bundles_post_ra>
